<compile_context>
chip_gen: v7x
topology: tpu7x:2x2x1
jax: 0.10.0
libtpu: 0.0.40
codegen_flags: <defaults>
</compile_context>

<pallas_src>
import jax
import jax.numpy as jnp
from jax import lax
from jax.experimental import pallas as pl
from jax.experimental.pallas import tpu as pltpu

_EPS = 1e-5
_LANE = 128


def _ceil_to(v, m):
    return ((v + m - 1) // m) * m


# ----------------------------------------------------------------------------
# Parameter construction (deterministic, synthetic) + BN folding
# ----------------------------------------------------------------------------
def init_params(key, inp, oup, expand_ratio):
    hidden = int(round(inp * expand_ratio))
    ks = jax.random.split(key, 16)

    def rnd(k, shape, scale=0.1):
        return scale * jax.random.normal(k, shape, jnp.float32)

    def bn_params(k0, k1, k2, k3, c):
        gamma = 1.0 + rnd(k0, (c,))
        beta = rnd(k1, (c,))
        mean = rnd(k2, (c,))
        var = 1.0 + jnp.abs(rnd(k3, (c,)))
        return gamma, beta, mean, var

    raw = {}
    # expand 1x1 conv (torch weight shape: (hidden, inp, 1, 1)) + BN1
    raw["w_e"] = rnd(ks[0], (hidden, inp))
    raw["bn1"] = bn_params(ks[1], ks[2], ks[3], ks[4], hidden)
    # depthwise 3x3 conv (torch weight shape: (hidden, 1, 3, 3)) + BN2
    raw["w_dw"] = rnd(ks[5], (hidden, 1, 3, 3))
    raw["bn2"] = bn_params(ks[6], ks[7], ks[8], ks[9], hidden)
    # projection 1x1 conv (torch weight shape: (oup, hidden, 1, 1)) + BN3
    raw["w_p"] = rnd(ks[10], (oup, hidden))
    raw["bn3"] = bn_params(ks[11], ks[12], ks[13], ks[14], oup)

    def fold(gamma, beta, mean, var):
        s = gamma / jnp.sqrt(var + _EPS)
        return s, beta - mean * s

    s1, sh1 = fold(*raw["bn1"])
    s2, sh2 = fold(*raw["bn2"])
    s3, sh3 = fold(*raw["bn3"])

    folded = {
        "w1": (raw["w_e"] * s1[:, None]).T,                 # (inp, hidden)
        "b1": sh1,                                          # (hidden,)
        "wd": (raw["w_dw"].reshape(hidden, 9) * s2[:, None]).T,  # (9, hidden)
        "bd": sh2,                                          # (hidden,)
        "w2": (raw["w_p"] * s3[:, None]).T,                 # (hidden, oup)
        "b2": sh3,                                          # (oup,)
    }
    return raw, folded


# ----------------------------------------------------------------------------
# Pallas kernel
# ----------------------------------------------------------------------------
def _make_kernel(W, Wo, So, rows_in, cin_p, hidden_p, oup_p, stride,
                 has_expand, use_res):
    def kernel(x_ref, mask_ref, w1_ref, b1_ref, wd_ref, bd_ref, w2_ref, b2_ref,
               o_ref, pad_ref):
        s = pl.program_id(1)
        start_p = pl.multiple_of(s * (So * stride), So * stride)

        # Strip of the spatially pre-padded input, incl. the 3x3 halo rows.
        xs = x_ref[0, pl.ds(start_p, rows_in), :, :]        # (rows_in, W+2, cin_p) f32

        # ---- 1x1 expand conv + BN + ReLU6 (skipped when expand_ratio == 1) ----
        if has_expand:
            t = jnp.dot(xs.reshape(rows_in * (W + 2), cin_p).astype(jnp.bfloat16),
                        w1_ref[...], preferred_element_type=jnp.float32)
            t = jnp.clip(t + b1_ref[...], 0.0, 6.0)
            t = t.reshape(rows_in, W + 2, hidden_p)
            # Depthwise zero padding must be applied to the *expanded* activation
            # (relu6(0 @ w1 + b1) != 0): one multiply with a precomputed per-strip
            # {0,1} ring mask.  No scratch zero-init anywhere.
            pad_ref[...] = t * mask_ref[0]
        else:
            # hidden == inp: the pre-padded input already has zeros on the ring.
            pad_ref[...] = xs

        # ---- 3x3 depthwise conv (stride) + BN + ReLU6: 9 shifted VPU MACs ----
        wdm = wd_ref[...]                                   # (9, hidden_p) f32
        acc = None
        for ky in range(3):
            for kx in range(3):
                if stride == 1:
                    tap = pad_ref[ky:ky + So, kx:kx + Wo, :]
                else:
                    tap = pad_ref[pl.ds(ky, So, stride=stride),
                                  pl.ds(kx, Wo, stride=stride), :]
                contrib = tap * wdm[ky * 3 + kx, :]
                if acc is None:
                    acc = contrib + bd_ref[...]   # fold BN bias into the first tap
                else:
                    acc = acc + contrib
        acc = jnp.clip(acc, 0.0, 6.0)

        # ---- 1x1 projection conv + BN (linear bottleneck, no ReLU) ----
        y = jnp.dot(acc.reshape(So * Wo, hidden_p).astype(jnp.bfloat16),
                    w2_ref[...], preferred_element_type=jnp.float32)
        y = (y + b2_ref[...]).reshape(So, Wo, oup_p)

        # ---- residual connection (stride == 1 and inp == oup) ----
        if use_res:
            # cin_p == oup_p by construction; padded channels of x are zero.
            y = y + xs[1:1 + So, 1:1 + W, :]

        o_ref[0] = y

    return kernel


# ----------------------------------------------------------------------------
# Wrappers
# ----------------------------------------------------------------------------
def inverted_residual_pallas_nhwc(x_nhwc, folded, *, inp, oup, stride,
                                  expand_ratio, max_strip_rows=8):
    """NHWC-native entry point (keep activations NHWC end-to-end across layers)."""
    assert stride in (1, 2)
    N, H, W, C = x_nhwc.shape
    assert C == inp
    hidden = int(round(inp * expand_ratio))
    has_expand = expand_ratio != 1
    use_res = (stride == 1) and (inp == oup)
    Ho = (H - 1) // stride + 1
    Wo = (W - 1) // stride + 1

    # Lane-dense channel padding (zero cols/rows keep the math exact).
    hidden_p = _ceil_to(hidden, _LANE)
    oup_p = _ceil_to(oup, _LANE)
    if not has_expand:
        cin_p = hidden_p          # x is used directly as the expanded activation
    elif use_res:
        cin_p = oup_p             # x is added to the (lane-padded) output
    else:
        cin_p = inp               # contraction dim only; no padding needed

    # Output-row strip size: bounds VMEM / vreg live ranges per grid step and,
    # together with batch, gives a >=2-extent parallel grid (v7x megacore).
    So = next(d for d in range(min(max_strip_rows, Ho), 0, -1) if Ho % d == 0)
    n_strips = Ho // So
    rows_in = (So - 1) * stride + 3     # padded input rows per strip incl. halo

    # Spatial zero-pad once in the wrapper + lane-pad channels (f32 kept for the
    # residual add; the matmul operands are cast to bf16 inside the kernel).
    x_p = jnp.pad(x_nhwc.astype(jnp.float32),
                  ((0, 0), (1, 1), (1, 1), (0, cin_p - inp)))

    # Per-strip {0,1} ring mask (1 = interior pixel of the padded image).
    row_idx = (jnp.arange(rows_in)[None, :, None]
               + (jnp.arange(n_strips) * So * stride)[:, None, None])
    col_idx = jnp.arange(W + 2)[None, None, :]
    valid = ((row_idx >= 1) & (row_idx <= H) & (col_idx >= 1) & (col_idx <= W))
    pad_mask = valid.astype(jnp.float32)[..., None]          # (n_strips, rows_in, W+2, 1)

    # Lane-pad the folded weights / biases; 1x1 weights in bf16 for the MXU.
    w1 = (jnp.zeros((cin_p, hidden_p), jnp.float32)
          .at[:inp, :hidden].set(folded["w1"]).astype(jnp.bfloat16))
    b1 = jnp.zeros((1, hidden_p), jnp.float32).at[0, :hidden].set(folded["b1"])
    wd = jnp.zeros((9, hidden_p), jnp.float32).at[:, :hidden].set(folded["wd"])
    bd = jnp.zeros((1, hidden_p), jnp.float32).at[0, :hidden].set(folded["bd"])
    w2 = (jnp.zeros((hidden_p, oup_p), jnp.float32)
          .at[:hidden, :oup].set(folded["w2"]).astype(jnp.bfloat16))
    b2 = jnp.zeros((1, oup_p), jnp.float32).at[0, :oup].set(folded["b2"])

    kernel = _make_kernel(W, Wo, So, rows_in, cin_p, hidden_p, oup_p, stride,
                          has_expand, use_res)

    out = pl.pallas_call(
        kernel,
        out_shape=jax.ShapeDtypeStruct((N, Ho, Wo, oup_p), jnp.float32),
        grid_spec=pltpu.PrefetchScalarGridSpec(
            num_scalar_prefetch=0,
            grid=(N, n_strips),
            in_specs=[
                # Whole (pre-padded) image per batch element; block index is
                # constant along the strip axis so it is not re-DMA'd per strip.
                pl.BlockSpec((1, H + 2, W + 2, cin_p), lambda n, s: (n, 0, 0, 0)),
                # Per-strip ring mask.
                pl.BlockSpec((1, rows_in, W + 2, 1), lambda n, s: (s, 0, 0, 0)),
                # Constant operands: fixed block index -> fetched once.
                pl.BlockSpec((cin_p, hidden_p), lambda n, s: (0, 0)),
                pl.BlockSpec((1, hidden_p), lambda n, s: (0, 0)),
                pl.BlockSpec((9, hidden_p), lambda n, s: (0, 0)),
                pl.BlockSpec((1, hidden_p), lambda n, s: (0, 0)),
                pl.BlockSpec((hidden_p, oup_p), lambda n, s: (0, 0)),
                pl.BlockSpec((1, oup_p), lambda n, s: (0, 0)),
            ],
            out_specs=pl.BlockSpec((1, So, Wo, oup_p), lambda n, s: (n, s, 0, 0)),
            scratch_shapes=[pltpu.VMEM((rows_in, W + 2, hidden_p), jnp.float32)],
        ),
        compiler_params=pltpu.CompilerParams(
            dimension_semantics=("parallel", "parallel"),
            vmem_limit_bytes=32 * 1024 * 1024),
    )(x_p, pad_mask, w1, b1, wd, bd, w2, b2)

    return out[..., :oup]     # drop lane padding; stays NHWC


def inverted_residual_pallas(x_nchw, folded, *, inp, oup, stride, expand_ratio):
    """NCHW convenience wrapper matching the PyTorch interface.  For multi-layer
    use, keep activations NHWC and call inverted_residual_pallas_nhwc directly to
    avoid a full HBM read+write per transpose."""
    x_nhwc = jnp.transpose(x_nchw, (0, 2, 3, 1))
    y = inverted_residual_pallas_nhwc(x_nhwc, folded, inp=inp, oup=oup,
                                      stride=stride, expand_ratio=expand_ratio)
    return jnp.transpose(y, (0, 3, 1, 2))


# ----------------------------------------------------------------------------
# Pure-JAX reference (mirrors the PyTorch module, NCHW, inference-mode BN, f32)
# ----------------------------------------------------------------------------
def reference_nchw(x, raw, stride, expand_ratio, use_res):
    def conv2d(x, w, stride=1, padding=0, groups=1):
        return lax.conv_general_dilated(
            x, w, window_strides=(stride, stride),
            padding=[(padding, padding), (padding, padding)],
            feature_group_count=groups,
            dimension_numbers=("NCHW", "OIHW", "NCHW"))

    def bn(x, gamma, beta, mean, var):
        s = gamma / jnp.sqrt(var + _EPS)
        return x * s[None, :, None, None] + (beta - mean * s)[None, :, None, None]

    def relu6(x):
        return jnp.clip(x, 0.0, 6.0)

    out = x
    if expand_ratio != 1:
        out = relu6(bn(conv2d(out, raw["w_e"][:, :, None, None]), *raw["bn1"]))
    hidden = raw["w_dw"].shape[0]
    out = relu6(bn(conv2d(out, raw["w_dw"], stride=stride, padding=1,
                          groups=hidden), *raw["bn2"]))
    out = bn(conv2d(out, raw["w_p"][:, :, None, None]), *raw["bn3"])
    return x + out if use_res else out


# ----------------------------------------------------------------------------
if __name__ == "__main__":
    key = jax.random.PRNGKey(0)
    kx, kp = jax.random.split(key)

    # InvertedResidual(inp=8, oup=8, stride=1, expand_ratio=6) -> residual path
    N, inp, oup, H, W = 2, 8, 8, 16, 16
    stride, expand_ratio = 1, 6

    x = jax.random.normal(kx, (N, inp, H, W), jnp.float32)
    raw, folded = init_params(kp, inp, oup, expand_ratio)

    y = inverted_residual_pallas(x, folded, inp=inp, oup=oup,
                                 stride=stride, expand_ratio=expand_ratio)
    jax.block_until_ready(y)

    use_res = (stride == 1) and (inp == oup)
    y_ref = reference_nchw(x, raw, stride, expand_ratio, use_res)
    err = float(jnp.max(jnp.abs(y - y_ref)))
    assert y.shape == y_ref.shape, (y.shape, y_ref.shape)
    # bf16 MXU operands with f32 accumulation -> relaxed tolerance vs the f32 reference.
    assert err < 5e-2, f"max abs err {err}"

    print("KERNEL_OK")
</pallas_src>

<mosaic_0001>
module attributes {stable_mosaic.version = 11 : i64} {
  func.func @kernel(%arg0: i32, %arg1: i32, %arg2: memref<1x18x18x128xf32, #tpu.memory_space<vmem>>, %arg3: memref<1x10x18x1xf32, #tpu.memory_space<vmem>>, %arg4: memref<128x128xbf16, #tpu.memory_space<vmem>>, %arg5: memref<1x128xf32, #tpu.memory_space<vmem>>, %arg6: memref<9x128xf32, #tpu.memory_space<vmem>>, %arg7: memref<1x128xf32, #tpu.memory_space<vmem>>, %arg8: memref<128x128xbf16, #tpu.memory_space<vmem>>, %arg9: memref<1x128xf32, #tpu.memory_space<vmem>>, %arg10: memref<1x8x16x128xf32, #tpu.memory_space<vmem>>, %arg11: memref<10x18x128xf32, #tpu.memory_space<vmem>>) attributes {dimension_semantics = [#tpu.dimension_semantics<parallel>, #tpu.dimension_semantics<parallel>], iteration_bounds = array<i64: 2, 2>, scalar_prefetch = 0 : i64, scratch_operands = 1 : i64, tpu.core_type = #tpu.core_type<tc>, window_params = [{transform_indices = @transform_0, window_bounds = array<i64: 1, 18, 18, 128>}, {transform_indices = @transform_1, window_bounds = array<i64: 1, 10, 18, 1>}, {pipeline_mode = #tpu.pipeline_mode<synchronous>, transform_indices = @transform_2, window_bounds = array<i64: 128, 128>}, {pipeline_mode = #tpu.pipeline_mode<synchronous>, transform_indices = @transform_3, window_bounds = array<i64: 1, 128>}, {pipeline_mode = #tpu.pipeline_mode<synchronous>, transform_indices = @transform_4, window_bounds = array<i64: 9, 128>}, {pipeline_mode = #tpu.pipeline_mode<synchronous>, transform_indices = @transform_5, window_bounds = array<i64: 1, 128>}, {pipeline_mode = #tpu.pipeline_mode<synchronous>, transform_indices = @transform_6, window_bounds = array<i64: 128, 128>}, {pipeline_mode = #tpu.pipeline_mode<synchronous>, transform_indices = @transform_7, window_bounds = array<i64: 1, 128>}, {transform_indices = @transform_8, window_bounds = array<i64: 1, 8, 16, 128>}]} {
    %c8_i32 = arith.constant 8 : i32
    %0 = arith.muli %arg1, %c8_i32 : i32
    %1 = tpu.assume_multiple %0, 8 : i32
    %c0 = arith.constant 0 : index
    %2 = arith.index_cast %1 : i32 to index
    %c0_0 = arith.constant 0 : index
    %c0_1 = arith.constant 0 : index
    %3 = vector.load %arg2[%c0, %2, %c0_0, %c0_1] : memref<1x18x18x128xf32, #tpu.memory_space<vmem>>, vector<1x10x18x128xf32>
    %4 = vector.shape_cast %3 : vector<1x10x18x128xf32> to vector<10x18x128xf32>
    %5 = vector.shape_cast %4 : vector<10x18x128xf32> to vector<180x128xf32>
    %6 = arith.truncf %5 : vector<180x128xf32> to vector<180x128xbf16>
    %c0_2 = arith.constant 0 : index
    %c0_3 = arith.constant 0 : index
    %7 = vector.load %arg4[%c0_2, %c0_3] : memref<128x128xbf16, #tpu.memory_space<vmem>>, vector<128x128xbf16>
    %cst = arith.constant dense<0.000000e+00> : vector<180x128xf32>
    %8 = tpu.matmul %6, %7, %cst {dimension_numbers = #tpu.dot_dimension_numbers<[1], [0], [0], [1], [0, 0, 1, 1], [], []>} : vector<180x128xbf16>, vector<128x128xbf16>, vector<180x128xf32> -> vector<180x128xf32>
    %c0_4 = arith.constant 0 : index
    %c0_5 = arith.constant 0 : index
    %9 = vector.load %arg5[%c0_4, %c0_5] : memref<1x128xf32, #tpu.memory_space<vmem>>, vector<1x128xf32>
    %10 = vector.broadcast %9 : vector<1x128xf32> to vector<180x128xf32>
    %11 = arith.addf %8, %10 : vector<180x128xf32>
    %cst_6 = arith.constant 0.000000e+00 : f32
    %cst_7 = arith.constant 6.000000e+00 : f32
    %12 = vector.broadcast %cst_6 : f32 to vector<180x128xf32>
    %13 = arith.maximumf %12, %11 : vector<180x128xf32>
    %14 = vector.broadcast %cst_7 : f32 to vector<180x128xf32>
    %15 = arith.minimumf %14, %13 : vector<180x128xf32>
    %16 = vector.shape_cast %15 : vector<180x128xf32> to vector<10x18x128xf32>
    %c0_8 = arith.constant 0 : index
    %c0_9 = arith.constant 0 : index
    %c0_10 = arith.constant 0 : index
    %c0_11 = arith.constant 0 : index
    %17 = vector.load %arg3[%c0_8, %c0_9, %c0_10, %c0_11] : memref<1x10x18x1xf32, #tpu.memory_space<vmem>>, vector<1x10x18x1xf32>
    %18 = vector.shape_cast %17 : vector<1x10x18x1xf32> to vector<10x18x1xf32>
    %19 = vector.broadcast %18 : vector<10x18x1xf32> to vector<10x18x128xf32>
    %20 = arith.mulf %16, %19 : vector<10x18x128xf32>
    %c0_12 = arith.constant 0 : index
    %c0_13 = arith.constant 0 : index
    %c0_14 = arith.constant 0 : index
    %21 = vector.load %arg11[%c0_12, %c0_13, %c0_14] : memref<10x18x128xf32, #tpu.memory_space<vmem>>, vector<10x18x128xf32>
    tpu.vector_store %arg11[%c0_12, %c0_13, %c0_14], %20 {strides = array<i32>} : memref<10x18x128xf32, #tpu.memory_space<vmem>>, vector<10x18x128xf32>,
    %c0_15 = arith.constant 0 : index
    %c0_16 = arith.constant 0 : index
    %22 = vector.load %arg6[%c0_15, %c0_16] : memref<9x128xf32, #tpu.memory_space<vmem>>, vector<9x128xf32>
    %c0_17 = arith.constant 0 : index
    %c0_18 = arith.constant 0 : index
    %c0_19 = arith.constant 0 : index
    %23 = vector.load %arg11[%c0_17, %c0_18, %c0_19] : memref<10x18x128xf32, #tpu.memory_space<vmem>>, vector<8x16x128xf32>
    %24 = vector.extract_strided_slice %22 {offsets = [0, 0], sizes = [1, 128], strides = [1, 1]} : vector<9x128xf32> to vector<1x128xf32>
    %25 = vector.shape_cast %24 : vector<1x128xf32> to vector<128xf32>
    %26 = vector.shape_cast %25 : vector<128xf32> to vector<1x1x128xf32>
    %27 = vector.broadcast %26 : vector<1x1x128xf32> to vector<8x16x128xf32>
    %28 = arith.mulf %23, %27 : vector<8x16x128xf32>
    %c0_20 = arith.constant 0 : index
    %c0_21 = arith.constant 0 : index
    %29 = vector.load %arg7[%c0_20, %c0_21] : memref<1x128xf32, #tpu.memory_space<vmem>>, vector<1x128xf32>
    %30 = vector.shape_cast %29 : vector<1x128xf32> to vector<1x1x128xf32>
    %31 = vector.broadcast %30 : vector<1x1x128xf32> to vector<8x16x128xf32>
    %32 = arith.addf %28, %31 : vector<8x16x128xf32>
    %c0_22 = arith.constant 0 : index
    %c1 = arith.constant 1 : index
    %c0_23 = arith.constant 0 : index
    %33 = vector.load %arg11[%c0_22, %c1, %c0_23] : memref<10x18x128xf32, #tpu.memory_space<vmem>>, vector<8x16x128xf32>
    %34 = vector.extract_strided_slice %22 {offsets = [1, 0], sizes = [1, 128], strides = [1, 1]} : vector<9x128xf32> to vector<1x128xf32>
    %35 = vector.shape_cast %34 : vector<1x128xf32> to vector<128xf32>
    %36 = vector.shape_cast %35 : vector<128xf32> to vector<1x1x128xf32>
    %37 = vector.broadcast %36 : vector<1x1x128xf32> to vector<8x16x128xf32>
    %38 = arith.mulf %33, %37 : vector<8x16x128xf32>
    %39 = arith.addf %32, %38 : vector<8x16x128xf32>
    %c0_24 = arith.constant 0 : index
    %c2 = arith.constant 2 : index
    %c0_25 = arith.constant 0 : index
    %40 = vector.load %arg11[%c0_24, %c2, %c0_25] : memref<10x18x128xf32, #tpu.memory_space<vmem>>, vector<8x16x128xf32>
    %41 = vector.extract_strided_slice %22 {offsets = [2, 0], sizes = [1, 128], strides = [1, 1]} : vector<9x128xf32> to vector<1x128xf32>
    %42 = vector.shape_cast %41 : vector<1x128xf32> to vector<128xf32>
    %43 = vector.shape_cast %42 : vector<128xf32> to vector<1x1x128xf32>
    %44 = vector.broadcast %43 : vector<1x1x128xf32> to vector<8x16x128xf32>
    %45 = arith.mulf %40, %44 : vector<8x16x128xf32>
    %46 = arith.addf %39, %45 : vector<8x16x128xf32>
    %c1_26 = arith.constant 1 : index
    %c0_27 = arith.constant 0 : index
    %c0_28 = arith.constant 0 : index
    %47 = vector.load %arg11[%c1_26, %c0_27, %c0_28] : memref<10x18x128xf32, #tpu.memory_space<vmem>>, vector<8x16x128xf32>
    %48 = vector.extract_strided_slice %22 {offsets = [3, 0], sizes = [1, 128], strides = [1, 1]} : vector<9x128xf32> to vector<1x128xf32>
    %49 = vector.shape_cast %48 : vector<1x128xf32> to vector<128xf32>
    %50 = vector.shape_cast %49 : vector<128xf32> to vector<1x1x128xf32>
    %51 = vector.broadcast %50 : vector<1x1x128xf32> to vector<8x16x128xf32>
    %52 = arith.mulf %47, %51 : vector<8x16x128xf32>
    %53 = arith.addf %46, %52 : vector<8x16x128xf32>
    %c1_29 = arith.constant 1 : index
    %c1_30 = arith.constant 1 : index
    %c0_31 = arith.constant 0 : index
    %54 = vector.load %arg11[%c1_29, %c1_30, %c0_31] : memref<10x18x128xf32, #tpu.memory_space<vmem>>, vector<8x16x128xf32>
    %55 = vector.extract_strided_slice %22 {offsets = [4, 0], sizes = [1, 128], strides = [1, 1]} : vector<9x128xf32> to vector<1x128xf32>
    %56 = vector.shape_cast %55 : vector<1x128xf32> to vector<128xf32>
    %57 = vector.shape_cast %56 : vector<128xf32> to vector<1x1x128xf32>
    %58 = vector.broadcast %57 : vector<1x1x128xf32> to vector<8x16x128xf32>
    %59 = arith.mulf %54, %58 : vector<8x16x128xf32>
    %60 = arith.addf %53, %59 : vector<8x16x128xf32>
    %c1_32 = arith.constant 1 : index
    %c2_33 = arith.constant 2 : index
    %c0_34 = arith.constant 0 : index
    %61 = vector.load %arg11[%c1_32, %c2_33, %c0_34] : memref<10x18x128xf32, #tpu.memory_space<vmem>>, vector<8x16x128xf32>
    %62 = vector.extract_strided_slice %22 {offsets = [5, 0], sizes = [1, 128], strides = [1, 1]} : vector<9x128xf32> to vector<1x128xf32>
    %63 = vector.shape_cast %62 : vector<1x128xf32> to vector<128xf32>
    %64 = vector.shape_cast %63 : vector<128xf32> to vector<1x1x128xf32>
    %65 = vector.broadcast %64 : vector<1x1x128xf32> to vector<8x16x128xf32>
    %66 = arith.mulf %61, %65 : vector<8x16x128xf32>
    %67 = arith.addf %60, %66 : vector<8x16x128xf32>
    %c2_35 = arith.constant 2 : index
    %c0_36 = arith.constant 0 : index
    %c0_37 = arith.constant 0 : index
    %68 = vector.load %arg11[%c2_35, %c0_36, %c0_37] : memref<10x18x128xf32, #tpu.memory_space<vmem>>, vector<8x16x128xf32>
    %69 = vector.extract_strided_slice %22 {offsets = [6, 0], sizes = [1, 128], strides = [1, 1]} : vector<9x128xf32> to vector<1x128xf32>
    %70 = vector.shape_cast %69 : vector<1x128xf32> to vector<128xf32>
    %71 = vector.shape_cast %70 : vector<128xf32> to vector<1x1x128xf32>
    %72 = vector.broadcast %71 : vector<1x1x128xf32> to vector<8x16x128xf32>
    %73 = arith.mulf %68, %72 : vector<8x16x128xf32>
    %74 = arith.addf %67, %73 : vector<8x16x128xf32>
    %c2_38 = arith.constant 2 : index
    %c1_39 = arith.constant 1 : index
    %c0_40 = arith.constant 0 : index
    %75 = vector.load %arg11[%c2_38, %c1_39, %c0_40] : memref<10x18x128xf32, #tpu.memory_space<vmem>>, vector<8x16x128xf32>
    %76 = vector.extract_strided_slice %22 {offsets = [7, 0], sizes = [1, 128], strides = [1, 1]} : vector<9x128xf32> to vector<1x128xf32>
    %77 = vector.shape_cast %76 : vector<1x128xf32> to vector<128xf32>
    %78 = vector.shape_cast %77 : vector<128xf32> to vector<1x1x128xf32>
    %79 = vector.broadcast %78 : vector<1x1x128xf32> to vector<8x16x128xf32>
    %80 = arith.mulf %75, %79 : vector<8x16x128xf32>
    %81 = arith.addf %74, %80 : vector<8x16x128xf32>
    %c2_41 = arith.constant 2 : index
    %c2_42 = arith.constant 2 : index
    %c0_43 = arith.constant 0 : index
    %82 = vector.load %arg11[%c2_41, %c2_42, %c0_43] : memref<10x18x128xf32, #tpu.memory_space<vmem>>, vector<8x16x128xf32>
    %83 = vector.extract_strided_slice %22 {offsets = [8, 0], sizes = [1, 128], strides = [1, 1]} : vector<9x128xf32> to vector<1x128xf32>
    %84 = vector.shape_cast %83 : vector<1x128xf32> to vector<128xf32>
    %85 = vector.shape_cast %84 : vector<128xf32> to vector<1x1x128xf32>
    %86 = vector.broadcast %85 : vector<1x1x128xf32> to vector<8x16x128xf32>
    %87 = arith.mulf %82, %86 : vector<8x16x128xf32>
    %88 = arith.addf %81, %87 : vector<8x16x128xf32>
    %cst_44 = arith.constant 0.000000e+00 : f32
    %cst_45 = arith.constant 6.000000e+00 : f32
    %89 = vector.broadcast %cst_44 : f32 to vector<8x16x128xf32>
    %90 = arith.maximumf %89, %88 : vector<8x16x128xf32>
    %91 = vector.broadcast %cst_45 : f32 to vector<8x16x128xf32>
    %92 = arith.minimumf %91, %90 : vector<8x16x128xf32>
    %93 = vector.shape_cast %92 : vector<8x16x128xf32> to vector<128x128xf32>
    %94 = arith.truncf %93 : vector<128x128xf32> to vector<128x128xbf16>
    %c0_46 = arith.constant 0 : index
    %c0_47 = arith.constant 0 : index
    %95 = vector.load %arg8[%c0_46, %c0_47] : memref<128x128xbf16, #tpu.memory_space<vmem>>, vector<128x128xbf16>
    %cst_48 = arith.constant dense<0.000000e+00> : vector<128x128xf32>
    %96 = tpu.matmul %94, %95, %cst_48 {dimension_numbers = #tpu.dot_dimension_numbers<[1], [0], [0], [1], [0, 0, 1, 1], [], []>} : vector<128x128xbf16>, vector<128x128xbf16>, vector<128x128xf32> -> vector<128x128xf32>
    %c0_49 = arith.constant 0 : index
    %c0_50 = arith.constant 0 : index
    %97 = vector.load %arg9[%c0_49, %c0_50] : memref<1x128xf32, #tpu.memory_space<vmem>>, vector<1x128xf32>
    %98 = vector.broadcast %97 : vector<1x128xf32> to vector<128x128xf32>
    %99 = arith.addf %96, %98 : vector<128x128xf32>
    %100 = vector.shape_cast %99 : vector<128x128xf32> to vector<8x16x128xf32>
    %101 = vector.extract_strided_slice %4 {offsets = [1, 1, 0], sizes = [8, 16, 128], strides = [1, 1, 1]} : vector<10x18x128xf32> to vector<8x16x128xf32>
    %102 = arith.addf %100, %101 : vector<8x16x128xf32>
    %c0_51 = arith.constant 0 : index
    %c0_52 = arith.constant 0 : index
    %c0_53 = arith.constant 0 : index
    %c0_54 = arith.constant 0 : index
    %103 = vector.load %arg10[%c0_51, %c0_52, %c0_53, %c0_54] : memref<1x8x16x128xf32, #tpu.memory_space<vmem>>, vector<1x8x16x128xf32>
    %104 = vector.shape_cast %103 : vector<1x8x16x128xf32> to vector<8x16x128xf32>
    %105 = vector.shape_cast %102 : vector<8x16x128xf32> to vector<1x8x16x128xf32>
    tpu.vector_store %arg10[%c0_51, %c0_52, %c0_53, %c0_54], %105 {strides = array<i32>} : memref<1x8x16x128xf32, #tpu.memory_space<vmem>>, vector<1x8x16x128xf32>,
    return
  }
  func.func @transform_0(%arg0: i32, %arg1: i32) -> (i32, i32, i32, i32) {
    %c0_i32 = arith.constant 0 : i32
    %c0_i32_0 = arith.constant 0 : i32
    %c0_i32_1 = arith.constant 0 : i32
    %c0_i32_2 = arith.constant 0 : i32
    return %arg0, %c0_i32, %c0_i32_0, %c0_i32_1 : i32, i32, i32, i32
  }
  func.func @transform_1(%arg0: i32, %arg1: i32) -> (i32, i32, i32, i32) {
    %c0_i32 = arith.constant 0 : i32
    %c0_i32_0 = arith.constant 0 : i32
    %c0_i32_1 = arith.constant 0 : i32
    %c0_i32_2 = arith.constant 0 : i32
    return %arg1, %c0_i32, %c0_i32_0, %c0_i32_1 : i32, i32, i32, i32
  }
  func.func @transform_2(%arg0: i32, %arg1: i32) -> (i32, i32) {
    %c0_i32 = arith.constant 0 : i32
    %c0_i32_0 = arith.constant 0 : i32
    %c0_i32_1 = arith.constant 0 : i32
    return %c0_i32, %c0_i32_0 : i32, i32
  }
  func.func @transform_3(%arg0: i32, %arg1: i32) -> (i32, i32) {
    %c0_i32 = arith.constant 0 : i32
    %c0_i32_0 = arith.constant 0 : i32
    %c0_i32_1 = arith.constant 0 : i32
    return %c0_i32, %c0_i32_0 : i32, i32
  }
  func.func @transform_4(%arg0: i32, %arg1: i32) -> (i32, i32) {
    %c0_i32 = arith.constant 0 : i32
    %c0_i32_0 = arith.constant 0 : i32
    %c0_i32_1 = arith.constant 0 : i32
    return %c0_i32, %c0_i32_0 : i32, i32
  }
  func.func @transform_5(%arg0: i32, %arg1: i32) -> (i32, i32) {
    %c0_i32 = arith.constant 0 : i32
    %c0_i32_0 = arith.constant 0 : i32
    %c0_i32_1 = arith.constant 0 : i32
    return %c0_i32, %c0_i32_0 : i32, i32
  }
  func.func @transform_6(%arg0: i32, %arg1: i32) -> (i32, i32) {
    %c0_i32 = arith.constant 0 : i32
    %c0_i32_0 = arith.constant 0 : i32
    %c0_i32_1 = arith.constant 0 : i32
    return %c0_i32, %c0_i32_0 : i32, i32
  }
  func.func @transform_7(%arg0: i32, %arg1: i32) -> (i32, i32) {
    %c0_i32 = arith.constant 0 : i32
    %c0_i32_0 = arith.constant 0 : i32
    %c0_i32_1 = arith.constant 0 : i32
    return %c0_i32, %c0_i32_0 : i32, i32
  }
  func.func @transform_8(%arg0: i32, %arg1: i32) -> (i32, i32, i32, i32) {
    %c0_i32 = arith.constant 0 : i32
    %c0_i32_0 = arith.constant 0 : i32
    %c0_i32_1 = arith.constant 0 : i32
    return %arg0, %arg1, %c0_i32, %c0_i32_0 : i32, i32, i32, i32
  }
}

</mosaic_0001>

<bundles_post_ra>
// kernel: tpu_custom_call.1
= control target key start
LH: loop header
LB: loop body
LE: loop exit
PB: predicated region body
PF: predicated region fallthrough
CT: control target
= control target key end

     0   :  { %13 = vsyncpa [#allocation4], 0  ;;  %s6366_s0 = inlined_call_operand.vmem [shape: f32[2,18,18,128], index: 0, kind: input, shape index: {}]   ;;  %s6367_s1 = inlined_call_operand.vmem [shape: f32[2,10,18,1], index: 1, kind: input, shape index: {}]   ;;  %s6368_s2 = inlined_call_operand.vmem [shape: bf16[128,128], index: 2, kind: input, shape index: {}]   ;;  %s6369_s3 = inlined_call_operand.vmem [shape: f32[1,128], index: 3, kind: input, shape index: {}]   ;;  %s6370_s4 = inlined_call_operand.vmem [shape: f32[9,128], index: 4, kind: input, shape index: {}]   ;;  %s6371_s5 = inlined_call_operand.vmem [shape: f32[1,128], index: 5, kind: input, shape index: {}]   ;;  %s6372_s6 = inlined_call_operand.vmem [shape: bf16[128,128], index: 6, kind: input, shape index: {}]   ;;  %s6373_s7 = inlined_call_operand.vmem [shape: f32[1,128], index: 7, kind: input, shape index: {}]   ;;  %s6374_s8 = inlined_call_operand.hbm [shape: f32[2,16,16,128], index: 8, kind: output, shape index: {}]  }
   0x1   :  { %15 = vsyncpa [#allocation4 + $0x1], 0  ;;  %s4832_s27 = smov 0   ;;  %s4834_s28 = smov 0  }
   0x2   :  { %s4836_s29 = smov 0   ;;  %s4838_s30 = smov 0  }
   0x3   :  { %s4840_s9 = smov 0   ;;  %s4842_s10 = smov 0  }
   0x4   :  { %s4844_s11 = smov 0   ;;  %s4846_s12 = smov 0  }
   0x5 LB: > { %s4373_s13 = sadd.s32 4294967295, %s4776_s12   ;;  %s4374_s14 = sadd.s32 4294967294, %s4776_s12   ;;  %s4776_s12 = sphi %s4846_s12, %s21_s12   ;;  %s4772_s11 = sphi %s4844_s11, %s6504_s11   ;;  %s4768_s10 = sphi %s4842_s10, %s6503_s10   ;;  %s4764_s9 = sphi %s4840_s9, %s6502_s9   ;;  %s4760_s30 = sphi %s4838_s30, %s6501_s30   ;;  %s4756_s29 = sphi %s4836_s29, %s6500_s29   ;;  %s4752_s28 = sphi %s4834_s28, %s6499_s28   ;;  %s4748_s27 = sphi %s4832_s27, %s6498_s27  }
   0x6   : > { %s30_s15 = sadd.s32 1, %s4768_s10  ;;  %s33_s16 = sadd.s32 1, %s4772_s11 }
   0x7   : > { %p31_p0 = scmp.ge.s32.totalorder %s30_s15, 2  ;;  %p230_p1 = scmp.ne.s32.totalorder %s4756_s29, %s4752_s28 }
   0x8   : > { %p231_p2 = scmp.eq.s32.totalorder %s4373_s13, 3  ;;  %p236_p5 = scmp.ne.s32.totalorder %s4752_s28, %s4748_s27 }
   0x9   : > { %s6506_s15 = smov (%p31_p0, %s30_s15), 0  ;;  %s6508_s16 = smov (!%p31_p0, %s33_s16), %s4772_s11 }
   0xa   : > { %s216_s17 = ssub.s32 %s4768_s10, %s6506_s15  ;;  %p4883_p3 = por %p231_p2, %p230_p1 }
   0xb   : > { %p35_p4 = scmp.ge.s32.totalorder %s6508_s16, 2  ;;  %p237_p6 = scmp.eq.s32.totalorder %s4374_s14, 3 }
   0xc   : > { %p4377_p7 = scmp.ge.s32.totalorder %s4776_s12, 1  ;;  %p289_p9 = scmp.lt.s32.totalorder %s4776_s12, 5 }
   0xd   : > { %s6510_s16 = smov (%p35_p4, %s6508_s16), 0  ;;  %p4892_p8 = por %p237_p6, %p236_p5 }
   0xe   : > { %6388 = sst [smem:[#allocation6_spill]] %s6510_s16  ;;  %s215_s20 = ssub.s32 %s4772_s11, %s6510_s16 }
   0xf   : > { %s220_s21 = sadd.s32 1, %s4756_s29  ;;  %s217_s22 = sor.u32 %s216_s17, %s215_s20 }
  0x10   : > { %p290_p10 = pnand %p4377_p7, %p289_p9  ;;  %p218_p11 = scmp.eq.s32.totalorder %s217_s22, 0 }
  0x12   : > { %s4901_s23 = scalar_select %p218_p11, %s4756_s29, %s220_s21  }
  0x13   : > { %293 = sbr.rel (%p290_p10) target bundleno = 718 (0x2ce), region = 52 }
  0x1a   : > { %v4614_v0 = vld [vmem:[%s6368_s2] sm:$0xff]   ;;  %p328_p12 = scmp.lt.s32.totalorder %s4764_s9, 1  ;;  %v4615_v1 = vld [vmem:[%s6368_s2 + $0x8] sm:$0xff]   ;;  %s4382_s17 = smul.u32 192, %s4760_s30  ;;  %v4616_v2 = vld [vmem:[%s6368_s2 + $0x10] sm:$0xff]   ;;  %v407_v3 = vlaneseq  ;;  %v4778_v4 = vmov 0  }
  0x1b   : > { %4459 = vmatprep.subr.bf16.mxu0 %v4614_v0  ;;  %4612 = vset.pattern.permute.xlu0 %v4778_v4  ;;  %p333_p13 = scmp.lt.s32.totalorder %s4760_s30, 1  ;;  %v4617_v5 = vld [vmem:[%s6368_s2 + $0x18] sm:$0xff]   ;;  %v4779_v8 = vmov 1983009808   ;;  %v4618_v15 = vld [vmem:[%s6368_s2 + $0x20] sm:$0xff]   ;;  %v4619_v43 = vld [vmem:[%s6368_s2 + $0x28] sm:$0xff]  }
  0x1c   : > { %s329_s14 = scalar_select %p328_p12, %s4764_s9, 1  ;;  %4460 = vmatpush3.bf16.msra.mxu0 %v4614_v0  ;;  %4613 = vset.pattern.permute.xlu1 %v4778_v4  ;;  %v405_v9 = vunpack.c.l.s4 %v4779_v8  ;;  %v4927_v10 = vshrl.u32 %v407_v3, 7  ;;  %v4620_v62 = vld [vmem:[%s6368_s2 + $0x30] sm:$0xff]   ;;  %vm4177_vm0 = vcmask 1046528  }
  0x1d   : > { %4461 = vmatprep.subr.bf16.mxu0 %v4615_v1  ;;  %s334_s20 = scalar_select %p333_p13, %s4760_s30, 1 }
  0x1e   : > { %s4531_s22 = smul.u32 432, %s329_s14  ;;  %6390 = vst [vmem:[#allocation7_spill] sm:$0xff] %v4927_v10  ;;  %v406_v17 = vunpack.c.0.s8 %v405_v9  ;;  %s4418_s13 = sshll.u32 %s4764_s9, 5 }
  0x20   : > { %s332_s16 = scalar_lea.vmem %s6366_s0, %s4531_s22  ;;  %4462 = vmatpush3.bf16.msra.mxu0 %v4615_v1  ;;  %v4960_v26 = vsub.s32 %v406_v17, %v4927_v10 }
  0x21   : > { %s4919_s26 = scalar_lea.vmem %s332_s16, %s4382_s17  ;;  %4463 = vmatprep.subr.bf16.mxu0 %v4616_v2  ;;  %s4532_s16 = smul.u32 240, %s334_s20 }
  0x22   : > { %v343_v6 = vld [vmem:[%s4919_s26] sm:$0xff]  ;;  %v344_v7 = vld [vmem:[%s4919_s26 + $0x8] sm:$0xff]  ;;  %v346_v11 = vld [vmem:[%s4919_s26 + $0x18] sm:$0xff] }
  0x23   : > { %v347_v12 = vld [vmem:[%s4919_s26 + $0x20] sm:$0xff]  ;;  %v4932_v13 = vld [vmem:[%s4919_s26 + $0x30] sm:$0xff]  ;;  %v4935_v14 = vld [vmem:[%s4919_s26 + $0x38] sm:$0xff]  ;;  %v403_v16 = vcombine.high %v343_v6, %v343_v6  ;;  %v420_v18 = vcombine.high %v344_v7, %v344_v7  ;;  %v444_v20 = vcombine.high %v346_v11, %v346_v11  ;;  %s4957_s25 = scalar_lea.vmem %s6367_s1, %s4532_s16  ;;  %v410_v36 = vrot.slane %v343_v6, %v4960_v26  ;;  %s325_s16 = sand.u32 1, %s4752_s28  }
  0x24   : > { %4464 = vmatpush3.bf16.msra.mxu0 %v4616_v2  ;;  %v4941_v19 = vld [vmem:[%s4919_s26 + $0x48] sm:$0xff]  ;;  %v461_v21 = vcombine.high %v347_v12, %v347_v12  ;;  %v485_v22 = vcombine.high %v4932_v13, %v4932_v13  ;;  %v4946_v23 = vld [vmem:[%s4919_s26 + $0x50] sm:$0xff]  ;;  %v4949_v24 = vld [vmem:[%s4919_s26 + $0x60] sm:$0xff]  ;;  %v502_v27 = vcombine.high %v4935_v14, %v4935_v14  ;;  %v427_v38 = vrot.slane %v344_v7, %v4960_v26  ;;  %s4378_s22 = sshll.u32 %s325_s16, 7  ;;  %s6314_s21 = scalar_lea.sflag [#allocation4], %s325_s16 }
  0x25   : > { %4465 = vmatprep.subr.bf16.mxu0 %v4617_v5  ;;  %v4952_v25 = vld [vmem:[%s4919_s26 + $0x68] sm:$0xff]  ;;  %v526_v28 = vcombine.high %v4941_v19, %v4941_v19  ;;  %v543_v29 = vcombine.high %v4946_v23, %v4946_v23  ;;  %v4969_v30 = vld [vmem:[%s4919_s26 + $0x78] sm:$0xff]  ;;  %v4972_v31 = vld [vmem:[%s4919_s26 + $0x80] sm:$0xff]  ;;  %v567_v32 = vcombine.high %v4949_v24, %v4949_v24  ;;  %v417_v37 = vrot.slane %v403_v16, %v4960_v26  ;;  %s6242_s24 = scalar_lea.vmem [#allocation3], %s4378_s22 }
  0x26   : > { %v584_v33 = vcombine.high %v4952_v25, %v4952_v25  ;;  %v608_v34 = vcombine.high %v4969_v30, %v4969_v30  ;;  %v625_v35 = vcombine.high %v4972_v31, %v4972_v31  ;;  %v434_v39 = vrot.slane %v420_v18, %v4960_v26  ;;  %v4383_v40 = vld.sshfl [vmem:[%s4919_s26 + $0x10] sm:$0x3 pattern:$0x76325410]  ;;  %v1970_v41 = vld [vmem:[%s4957_s25] sm:$0xff]  ;;  %v1973_v42 = vld [vmem:[%s4957_s25 + $0x18] sm:$0xff] }
  0x27   : > { %v451_v44 = vrot.slane %v346_v11, %v4960_v26  ;;  %v458_v45 = vrot.slane %v444_v20, %v4960_v26  ;;  %v468_v46 = vrot.slane %v347_v12, %v4960_v26  ;;  %v475_v47 = vrot.slane %v461_v21, %v4960_v26  ;;  %2002 = vperm.xlu0 %4612, %v1970_v41   ;;  %v1971_v56 = vld [vmem:[%s4957_s25 + $0x8] sm:$0xff]  ;;  %v1974_v61 = vld [vmem:[%s4957_s25 + $0x20] sm:$0xff]  ;;  %v1977_v21 = vld [vmem:[%s4957_s25 + $0x38] sm:$0xff]  ;;  %s4283_s9 = sshll.u32 %s6242_s24, 4  ;;  %s6307_s9 = int_to_ptr.vmem [resolvable:$true] %s4283_s9 }
  0x28   : > { %4466 = vmatpush3.bf16.msra.mxu0 %v4617_v5  ;;  %v418_v48 = vcombine.high %v410_v36, %v410_v36  ;;  %v419_v49 = vcombine.high %v417_v37, %v417_v37  ;;  %v435_v50 = vcombine.high %v427_v38, %v427_v38  ;;  %v436_v51 = vcombine.high %v434_v39, %v434_v39  ;;  %v4674_v3 = vld.sshfl [vmem:[%s4919_s26 + $0x28] sm:$0x3 pattern:$0x76325410]  ;;  %s4682_s22 = scalar_lea.vmem %s6307_s9, 2048 }
  0x29   : > { %4467 = vmatprep.subr.bf16.mxu0 %v4618_v15  ;;  %v459_v52 = vcombine.high %v451_v44, %v451_v44  ;;  %v460_v53 = vcombine.high %v458_v45, %v458_v45  ;;  %v476_v54 = vcombine.high %v468_v46, %v468_v46  ;;  %v847_v55 = vcombine.low %v4383_v40, %v451_v44  ;;  %v4675_v20 = vld.sshfl [vmem:[%s4919_s26 + $0x40] sm:$0x3 pattern:$0x76325410]  ;;  %p4683_p0 = scmp.ne.s32.totalorder %s6307_s9, %s4682_s22 }
  0x2a   : > { %2014 = vperm.xlu1 %4613, %v1973_v42   ;;  %v813_v57 = vcombine.low %v410_v36, %v418_v48  ;;  %v814_v58 = vcombine.low %v417_v37, %v419_v49  ;;  %v830_v59 = vcombine.low %v427_v38, %v435_v50  ;;  %v831_v60 = vcombine.low %v434_v39, %v436_v51  ;;  %v4621_v36 = vld [vmem:[%s6368_s2 + $0x38] sm:$0xff]   ;;  %v1975_v50 = vld [vmem:[%s4957_s25 + $0x28] sm:$0x3] }
  0x2b   : > { %v848_v63 = vcombine.low %v459_v52, %v458_v45  ;;  %v855_v0 = vrot.slane %v847_v55, %v4960_v26  ;;  %v864_v1 = vcombine.low %v460_v53, %v468_v46  ;;  %v865_v2 = vcombine.low %v476_v54, %v475_v47  ;;  %2006 = vperm.xlu0 %4612, %v1971_v56   ;;  %v4676_v53 = vld.sshfl [vmem:[%s4919_s26 + $0x58] sm:$0x3 pattern:$0x76325410]  ;;  %v1979_v54 = vld [vmem:[%s4957_s25 + $0x48] sm:$0xff]  ;;  %p4684_p1 = pnand %p4683_p0, %p4883_p3 }
  0x2c   : > { %4468 = vmatpush3.bf16.msra.mxu0 %v4618_v15  ;;  %v821_v4 = vrot.slane %v813_v57, %v4960_v26  ;;  %v828_v5 = vrot.slane %v814_v58, %v4960_v26  ;;  %v838_v6 = vrot.slane %v830_v59, %v4960_v26  ;;  %v845_v7 = vrot.slane %v831_v60, %v4960_v26  ;;  %v1976_v15 = vld [vmem:[%s4957_s25 + $0x30] sm:$0xff] }
  0x2d   : > { %4469 = vmatprep.subr.bf16.mxu0 %v4619_v43  ;;  %v862_v8 = vrot.slane %v848_v63, %v4960_v26  ;;  %v872_v9 = vrot.slane %v864_v1, %v4960_v26  ;;  %v879_v11 = vrot.slane %v865_v2, %v4960_v26  ;;  %v477_v12 = vcombine.high %v475_v47, %v475_v47  ;;  %p4685_p2 = pneg %p4684_p1 }
  0x2e   : > { %2018 = vperm.xlu1 %4613, %v1974_v61   ;;  %v829_v16 = vcombine.low %v821_v4, %v828_v5  ;;  %v846_v17 = vcombine.low %v838_v6, %v845_v7  ;;  %v492_v18 = vrot.slane %v4932_v13, %v4960_v26  ;;  %v499_v39 = vrot.slane %v485_v22, %v4960_v26  ;;  %v1972_v13 = vld [vmem:[%s4957_s25 + $0x10] sm:$0x3] }
  0x2f   : > { %v863_v37 = vcombine.low %v855_v0, %v862_v8  ;;  %v880_v38 = vcombine.low %v872_v9, %v879_v11  ;;  %v509_v40 = vrot.slane %v4935_v14, %v4960_v26  ;;  %v516_v44 = vrot.slane %v502_v27, %v4960_v26  ;;  %2026 = vperm.xlu0 %4612, %v1976_v15   ;;  %v1980_v61 = vld [vmem:[%s4957_s25 + $0x50] sm:$0xff]  ;;  %v1978_v15 = vld [vmem:[%s4957_s25 + $0x40] sm:$0x3] }
  0x30   : > { %4470 = vmatpush3.bf16.msra.mxu0 %v4619_v43  ;;  %v1218_v41 = vpack.c.bf16 %v846_v17, %v829_v16  ;;  %v500_v42 = vcombine.high %v492_v18, %v492_v18  ;;  %v881_v43 = vcombine.low %v477_v12, %v4674_v3  ;;  %v501_v46 = vcombine.high %v499_v39, %v499_v39  ;;  %v4677_v12 = vld.sshfl [vmem:[%s4919_s26 + $0x70] sm:$0x3 pattern:$0x76325410] }
  0x31   : > { %4471 = vmatprep.subr.bf16.mxu0 %v4620_v62  ;;  %v1219_v45 = vpack.c.bf16 %v880_v38, %v863_v37  ;;  %v517_v47 = vcombine.high %v509_v40, %v509_v40  ;;  %v518_v49 = vcombine.high %v516_v44, %v516_v44  ;;  %v533_v27 = vrot.slane %v4941_v19, %v4960_v26  ;;  %v1982_v37 = vld [vmem:[%s4957_s25 + $0x60] sm:$0xff] }
  0x32   : > { %2030 = vperm.xlu1 %4613, %v1977_v21   ;;  %4475 = vmatprep.mubr.bf16.mxu0 %v1218_v41  ;;  %v882_v22 = vcombine.low %v492_v18, %v500_v42  ;;  %v889_v48 = vrot.slane %v881_v43, %v4960_v26  ;;  %v898_v51 = vcombine.low %v499_v39, %v501_v46 }
  0x33   : > { %v899_v14 = vcombine.low %v509_v40, %v517_v47  ;;  %v540_v52 = vrot.slane %v526_v28, %v4960_v26  ;;  %v550_v56 = vrot.slane %v4946_v23, %v4960_v26  ;;  %v915_v57 = vcombine.low %v516_v44, %v518_v49  ;;  %2010 = vperm.xlu0 %4612, %v1972_v13  }
  0x34   : > { %4472 = vmatpush3.bf16.msra.mxu0 %v4620_v62  ;;  %v896_v55 = vrot.slane %v882_v22, %v4960_v26  ;;  %v557_v58 = vrot.slane %v543_v29, %v4960_v26  ;;  %v906_v59 = vrot.slane %v898_v51, %v4960_v26  ;;  %v541_v19 = vcombine.high %v533_v27, %v533_v27  ;;  %v1981_v51 = vld [vmem:[%s4957_s25 + $0x58] sm:$0x3] }
  0x35   : > { %4473 = vmatprep.subr.bf16.mxu0 %v4621_v36  ;;  %v913_v60 = vrot.slane %v899_v14, %v4960_v26  ;;  %v542_v28 = vcombine.high %v540_v52, %v540_v52  ;;  %v916_v63 = vcombine.low %v4675_v20, %v533_v27  ;;  %v923_v0 = vrot.slane %v915_v57, %v4960_v26  ;;  %v361_v27 = vld [vmem:[%s4919_s26 + $0x90] sm:$0xff]  ;;  %v362_v57 = vld [vmem:[%s4919_s26 + $0x98] sm:$0xff] }
  0x36   : > { %2022 = vperm.xlu1 %4613, %v1975_v50   ;;  %v897_v62 = vcombine.low %v889_v48, %v896_v55  ;;  %v558_v1 = vcombine.high %v550_v56, %v550_v56  ;;  %v932_v23 = vcombine.low %v541_v19, %v540_v52  ;;  %v559_v3 = vcombine.high %v557_v58, %v557_v58  ;;  %v4678_v50 = vld.sshfl [vmem:[%s4919_s26 + $0x88] sm:$0x3 pattern:$0x76325410]  ;;  %v1985_v19 = vld [vmem:[%s4957_s25 + $0x78] sm:$0xff] }
  0x37   : > { %v914_v2 = vcombine.low %v906_v59, %v913_v60  ;;  %v933_v29 = vcombine.low %v542_v28, %v550_v56  ;;  %v930_v4 = vrot.slane %v916_v63, %v4960_v26  ;;  %v574_v5 = vrot.slane %v4949_v24, %v4960_v26  ;;  %2038 = vperm.xlu0 %4612, %v1979_v54  }
  0x38   : > { %4474 = vmatpush3.bf16.msra.mxu0 %v4621_v36  ;;  %v581_v6 = vrot.slane %v567_v32, %v4960_v26  ;;  %v940_v8 = vrot.slane %v932_v23, %v4960_v26  ;;  %v949_v11 = vcombine.low %v558_v1, %v557_v58  ;;  %v950_v20 = vcombine.low %v559_v3, %v4676_v53  ;;  %v4679_v1 = vld.sshfl [vmem:[%s4919_s26 + $0xa0] sm:$0x3 pattern:$0x76325410] }
  0x39   : > { %v1220_v7 = vpack.c.bf16 %v914_v2, %v897_v62  ;;  %v947_v9 = vrot.slane %v933_v29, %v4960_v26  ;;  %v931_v16 = vcombine.low %v923_v0, %v930_v4  ;;  %v582_v17 = vcombine.high %v574_v5, %v574_v5  ;;  %v1986_v62 = vld [vmem:[%s4957_s25 + $0x80] sm:$0xff] }
  0x3a   : > { %v583_v18 = vcombine.high %v581_v6, %v581_v6  ;;  %2042 = vperm.xlu1 %4613, %v1980_v61   ;;  %v957_v32 = vrot.slane %v949_v11, %v4960_v26  ;;  %v591_v21 = vrot.slane %v4952_v25, %v4960_v26  ;;  %v598_v36 = vrot.slane %v584_v33, %v4960_v26 }
  0x3b   : > { %4476 = vmatmul.mubr.bf16.vlgmr.msra.gmra.mrb[0].mxu0 %v1219_v45  ;;  %v948_v24 = vcombine.low %v940_v8, %v947_v9  ;;  %v964_v38 = vrot.slane %v950_v20, %v4960_v26  ;;  %v966_v39 = vcombine.low %v574_v5, %v582_v17  ;;  %2034 = vperm.xlu0 %4612, %v1978_v15   ;;  %v1983_v45 = vld [vmem:[%s4957_s25 + $0x68] sm:$0xff] }
  0x3c   : > { %4479 = vmatprep.mubr.bf16.mxu0 %v1220_v7  ;;  %v967_v40 = vcombine.low %v581_v6, %v583_v18  ;;  %v599_v42 = vcombine.high %v591_v21, %v591_v21  ;;  %v600_v43 = vcombine.high %v598_v36, %v598_v36  ;;  %v615_v44 = vrot.slane %v4969_v30, %v4960_v26  ;;  %v364_v5 = vld [vmem:[%s4919_s26 + $0xa8] sm:$0xff]  ;;  %v1984_v18 = vld [vmem:[%s4957_s25 + $0x70] sm:$0x3] }
  0x3d   : > { %v1221_v41 = vpack.c.bf16 %v948_v24, %v931_v16  ;;  %v965_v46 = vcombine.low %v957_v32, %v964_v38  ;;  %v974_v25 = vrot.slane %v966_v39, %v4960_v26  ;;  %v622_v47 = vrot.slane %v608_v34, %v4960_v26 }
  0x3e   : > { %v981_v33 = vrot.slane %v967_v40, %v4960_v26  ;;  %2050 = vperm.xlu1 %4613, %v1982_v37   ;;  %v623_v13 = vcombine.high %v615_v44, %v615_v44  ;;  %v983_v22 = vcombine.low %v591_v21, %v599_v42  ;;  %v984_v48 = vcombine.low %v598_v36, %v600_v43  ;;  %v1988_v36 = vld [vmem:[%s4957_s25 + $0x90] sm:$0xff] }
  0x3f   : > { %v1000_v49 = vcombine.low %v4677_v12, %v615_v44  ;;  %v624_v52 = vcombine.high %v622_v47, %v622_v47  ;;  %v632_v53 = vrot.slane %v4972_v31, %v4960_v26  ;;  %v639_v30 = vrot.slane %v625_v35, %v4960_v26  ;;  %2054 = vperm.xlu0 %4612, %v1983_v45   ;;  %v365_v12 = vld [vmem:[%s4919_s26 + $0xb0] sm:$0xff]  ;;  %v4680_v44 = vld.sshfl [vmem:[%s4919_s26 + $0xb8] sm:$0x3 pattern:$0x76325410] }
  0x40   : > { %v982_v14 = vcombine.low %v974_v25, %v981_v33  ;;  %v991_v34 = vrot.slane %v983_v22, %v4960_v26  ;;  %v998_v54 = vrot.slane %v984_v48, %v4960_v26  ;;  %v1001_v55 = vcombine.low %v623_v13, %v622_v47  ;;  %v1989_v13 = vld [vmem:[%s4957_s25 + $0x98] sm:$0xff] }
  0x41   : > { %v1008_v56 = vrot.slane %v1000_v49, %v4960_v26  ;;  %v640_v59 = vcombine.high %v632_v53, %v632_v53  ;;  %v641_v60 = vcombine.high %v639_v30, %v639_v30  ;;  %v656_v28 = vrot.slane %v361_v27, %v4960_v26 }
  0x42   : > { %v1222_v58 = vpack.c.bf16 %v982_v14, %v965_v46  ;;  %2046 = vperm.xlu1 %4613, %v1981_v51   ;;  %v999_v31 = vcombine.low %v991_v34, %v998_v54  ;;  %v1015_v35 = vrot.slane %v1001_v55, %v4960_v26  ;;  %v1017_v61 = vcombine.low %v624_v52, %v632_v53  ;;  %v367_v51 = vld [vmem:[%s4919_s26 + $0xc0] sm:$0xff]  ;;  %v368_v53 = vld [vmem:[%s4919_s26 + $0xc8] sm:$0xff] }
  0x43   : > { %4480 = vmatmul.mubr.bf16.gmra.mrb[4].mxu0 %v1221_v41  ;;  %v1018_v63 = vcombine.low %v640_v59, %v639_v30  ;;  %v1034_v0 = vcombine.low %v641_v60, %v4678_v50  ;;  %v649_v2 = vcombine.high %v361_v27, %v361_v27  ;;  %v666_v23 = vcombine.high %v362_v57, %v362_v57  ;;  %v1987_v30 = vld [vmem:[%s4957_s25 + $0x88] sm:$0x3] }
  0x44   : > { %4483 = vmatprep.mubr.bf16.mxu0 %v1222_v58  ;;  %v1016_v29 = vcombine.low %v1008_v56, %v1015_v35  ;;  %v664_v3 = vcombine.high %v656_v28, %v656_v28  ;;  %v1025_v4 = vrot.slane %v1017_v61, %v4960_v26  ;;  %v673_v6 = vrot.slane %v362_v57, %v4960_v26 }
  0x45   : > { %2062 = vperm.xlu0 %4612, %v1985_v19   ;;  %v1032_v7 = vrot.slane %v1018_v63, %v4960_v26  ;;  %v1042_v8 = vrot.slane %v1034_v0, %v4960_v26  ;;  %v663_v9 = vrot.slane %v649_v2, %v4960_v26  ;;  %v680_v11 = vrot.slane %v666_v23, %v4960_v26  ;;  %v4681_v19 = vld.sshfl [vmem:[%s4919_s26 + $0xd0] sm:$0x3 pattern:$0x76325410]  ;;  %v1991_v63 = vld [vmem:[%s4957_s25 + $0xa8] sm:$0xff] }
  0x46   : > { %2066 = vperm.xlu1 %4613, %v1986_v62   ;;  %v1223_v15 = vpack.c.bf16 %v1016_v29, %v999_v31  ;;  %v1035_v16 = vcombine.low %v656_v28, %v664_v3  ;;  %v681_v17 = vcombine.high %v673_v6, %v673_v6  ;;  %v697_v21 = vrot.slane %v364_v5, %v4960_v26  ;;  %v370_v62 = vld [vmem:[%s4919_s26 + $0xd8] sm:$0xff]  ;;  %v1992_v29 = vld [vmem:[%s4957_s25 + $0xb0] sm:$0xff] }
  0x47   : > { %v1033_v20 = vcombine.low %v1025_v4, %v1032_v7  ;;  %v665_v24 = vcombine.high %v663_v9, %v663_v9  ;;  %v682_v32 = vcombine.high %v680_v11, %v680_v11  ;;  %v690_v39 = vcombine.high %v364_v5, %v364_v5 }
  0x48   : > { %v1049_v37 = vrot.slane %v1035_v16, %v4960_v26  ;;  %v1052_v38 = vcombine.low %v673_v6, %v681_v17  ;;  %v707_v40 = vcombine.high %v365_v12, %v365_v12  ;;  %v1069_v43 = vcombine.low %v4679_v1, %v697_v21  ;;  %v371_v6 = vld [vmem:[%s4919_s26 + $0xe0] sm:$0xff] }
  0x49   : > { %v1051_v41 = vcombine.low %v663_v9, %v665_v24  ;;  %v1068_v42 = vcombine.low %v680_v11, %v682_v32  ;;  %v705_v45 = vcombine.high %v697_v21, %v697_v21  ;;  %2058 = vperm.xlu0 %4612, %v1984_v18   ;;  %v704_v33 = vrot.slane %v690_v39, %v4960_v26  ;;  %v1990_v18 = vld [vmem:[%s4957_s25 + $0xa0] sm:$0x3] }
  0x4a   : > { %v1050_v46 = vcombine.low %v1042_v8, %v1049_v37  ;;  %v1066_v25 = vrot.slane %v1052_v38, %v4960_v26  ;;  %v714_v47 = vrot.slane %v365_v12, %v4960_v26  ;;  %2074 = vperm.xlu1 %4613, %v1988_v36   ;;  %v1083_v49 = vrot.slane %v1069_v43, %v4960_v26 }
  0x4b   : > { %4484 = vmatmul.mubr.bf16.gmra.mrb[8].mxu0 %v1223_v15  ;;  %v1059_v22 = vrot.slane %v1051_v41, %v4960_v26  ;;  %v1076_v48 = vrot.slane %v1068_v42, %v4960_v26  ;;  %v721_v50 = vrot.slane %v707_v40, %v4960_v26  ;;  %v706_v27 = vcombine.high %v704_v33, %v704_v33  ;;  %v1994_v40 = vld [vmem:[%s4957_s25 + $0xc0] sm:$0xff] }
  0x4c   : > { %v1224_v14 = vpack.c.bf16 %v1050_v46, %v1033_v20  ;;  %v722_v52 = vcombine.high %v714_v47, %v714_v47  ;;  %v1085_v56 = vcombine.low %v705_v45, %v704_v33  ;;  %v731_v59 = vcombine.high %v367_v51, %v367_v51 }
  0x4d   : > { %v1067_v34 = vcombine.low %v1059_v22, %v1066_v25  ;;  %v1084_v54 = vcombine.low %v1076_v48, %v1083_v49  ;;  %v723_v55 = vcombine.high %v721_v50, %v721_v50  ;;  %2078 = vperm.xlu0 %4612, %v1989_v13   ;;  %v1086_v57 = vcombine.low %v706_v27, %v714_v47  ;;  %v4384_v47 = vld.sshfl [vmem:[%s4919_s26 + $0xe8] sm:$0x3 pattern:$0x76325410] }
  0x4e   : > { %4487 = vmatprep.mubr.bf16.mxu0 %v1224_v14  ;;  %v1102_v58 = vcombine.low %v722_v52, %v721_v50  ;;  %v738_v60 = vrot.slane %v367_v51, %v4960_v26  ;;  %v1093_v35 = vrot.slane %v1085_v56, %v4960_v26  ;;  %v748_v61 = vcombine.high %v368_v53, %v368_v53  ;;  %v1995_v13 = vld [vmem:[%s4957_s25 + $0xc8] sm:$0xff]  ;;  %v1993_v52 = vld [vmem:[%s4957_s25 + $0xb8] sm:$0x3] }
  0x4f   : > { %v1225_v31 = vpack.c.bf16 %v1084_v54, %v1067_v34  ;;  %v1103_v28 = vcombine.low %v723_v55, %v4680_v44  ;;  %2070 = vperm.xlu1 %4613, %v1987_v30   ;;  %v1100_v0 = vrot.slane %v1086_v57, %v4960_v26  ;;  %v745_v2 = vrot.slane %v731_v59, %v4960_v26  ;;  %v1997_v55 = vld [vmem:[%s4957_s25 + $0xd8] sm:$0xff]  ;;  %v1998_v59 = vld [vmem:[%s4957_s25 + $0xe0] sm:$0xff] }
  0x50   : > { %v1110_v1 = vrot.slane %v1102_v58, %v4960_v26  ;;  %v746_v23 = vcombine.high %v738_v60, %v738_v60  ;;  %v755_v4 = vrot.slane %v368_v53, %v4960_v26  ;;  %v762_v5 = vrot.slane %v748_v61, %v4960_v26 }
  0x51   : > { %v1117_v3 = vrot.slane %v1103_v28, %v4960_v26  ;;  %v1101_v7 = vcombine.low %v1093_v35, %v1100_v0  ;;  %v747_v8 = vcombine.high %v745_v2, %v745_v2  ;;  %v772_v11 = vcombine.high %v370_v62, %v370_v62  ;;  %2086 = vperm.xlu0 %4612, %v1991_v63   ;;  %v1999_v28 = vld [vmem:[%s4957_s25 + $0xe8] sm:$0x3] }
  0x52   : > { %v1119_v9 = vcombine.low %v738_v60, %v746_v23  ;;  %v763_v15 = vcombine.high %v755_v4, %v755_v4  ;;  %v764_v16 = vcombine.high %v762_v5, %v762_v5  ;;  %v779_v17 = vrot.slane %v370_v62, %v4960_v26 }
  0x53   : > { %4488 = vmatmul.mubr.bf16.gmra.mrb[12].mxu0 %v1225_v31  ;;  %v1118_v12 = vcombine.low %v1110_v1, %v1117_v3  ;;  %2090 = vperm.xlu1 %4613, %v1992_v29   ;;  %v1120_v20 = vcombine.low %v745_v2, %v747_v8  ;;  %v786_v32 = vrot.slane %v772_v11, %v4960_v26  ;;  %v4642_v1 = vld [vmem:[%s6372_s6] sm:$0xff]   ;;  %v4643_v29 = vld [vmem:[%s6372_s6 + $0x8] sm:$0xff]   ;;  %v4645_v11 = vld [vmem:[%s6372_s6 + $0x18] sm:$0xff]  }
  0x54   : > { %v1127_v24 = vrot.slane %v1119_v9, %v4960_v26  ;;  %v789_v21 = vcombine.high %v371_v6, %v371_v6  ;;  %v1136_v37 = vcombine.low %v755_v4, %v763_v15  ;;  %v1137_v38 = vcombine.low %v762_v5, %v764_v16  ;;  %4499 = vmatprep.subr.bf16.mxu1 %v4642_v1  ;;  %v4646_v16 = vld [vmem:[%s6372_s6 + $0x20] sm:$0xff]  }
  0x55   : > { %v1226_v36 = vpack.c.bf16 %v1118_v12, %v1101_v7  ;;  %v787_v39 = vcombine.high %v779_v17, %v779_v17  ;;  %v1134_v41 = vrot.slane %v1120_v20, %v4960_v26  ;;  %v788_v42 = vcombine.high %v786_v32, %v786_v32  ;;  %2082 = vperm.xlu0 %4612, %v1990_v18   ;;  %v4644_v7 = vld [vmem:[%s6372_s6 + $0x10] sm:$0xff]   ;;  %v4647_v20 = vld [vmem:[%s6372_s6 + $0x28] sm:$0xff]  }
  0x56   : > { %v796_v43 = vrot.slane %v371_v6, %v4960_v26  ;;  %v803_v44 = vrot.slane %v789_v21, %v4960_v26  ;;  %v1144_v45 = vrot.slane %v1136_v37, %v4960_v26  ;;  %v1151_v46 = vrot.slane %v1137_v38, %v4960_v26  ;;  %4500 = vmatpush3.bf16.msra.mxu1 %v4642_v1 }
  0x57   : > { %4491 = vmatprep.mubr.bf16.mxu0 %v1226_v36  ;;  %v1153_v25 = vcombine.low %v4681_v19, %v779_v17  ;;  %v1154_v33 = vcombine.low %v787_v39, %v786_v32  ;;  %v1135_v22 = vcombine.low %v1127_v24, %v1134_v41  ;;  %2098 = vperm.xlu1 %4613, %v1994_v40   ;;  %v1996_v19 = vld [vmem:[%s4957_s25 + $0xd0] sm:$0x3]  ;;  %v4780_v36 = vmov 269488144   ;;  %s4422_s25 = sshll.u32 %s4760_s30, 4 }
  0x58   : > { %v804_v48 = vcombine.high %v796_v43, %v796_v43  ;;  %v1170_v49 = vcombine.low %v788_v42, %v796_v43  ;;  %v805_v50 = vcombine.high %v803_v44, %v803_v44  ;;  %v1152_v51 = vcombine.low %v1144_v45, %v1151_v46  ;;  %4501 = vmatprep.subr.bf16.mxu1 %v4643_v29  ;;  %v4648_v32 = vld [vmem:[%s6372_s6 + $0x30] sm:$0xff]   ;;  %s4280_s14 = sadd.s32 %s4422_s25, %s4418_s13  ;;  %s4784_s25 = smov [#allocation3]  }
  0x59   : > { %v1161_v14 = vrot.slane %v1153_v25, %v4960_v26  ;;  %v1168_v27 = vrot.slane %v1154_v33, %v4960_v26  ;;  %2102 = vperm.xlu0 %4612, %v1995_v13   ;;  %v2121_v37 = vunpack.c.l.s4 %v4780_v36  ;;  %v4781_v38 = vmov 842150450   ;;  %s4419_s30 = sshll.u32 %s4280_s14, 7  ;;  %s4686_s13 = sshll.u32 %s4784_s25, 4  ;;  %s4687_s13 = int_to_ptr.vmem [resolvable:$false] %s4686_s13 }
  0x5a   : > { %v1171_v53 = vcombine.low %v804_v48, %v803_v44  ;;  %v1178_v30 = vrot.slane %v1170_v49, %v4960_v26  ;;  %v1187_v34 = vcombine.low %v805_v50, %v4384_v47  ;;  %v1227_v54 = vpack.c.bf16 %v1152_v51, %v1135_v22  ;;  %4502 = vmatpush3.bf16.msra.mxu1 %v4643_v29  ;;  %v4649_v44 = vld [vmem:[%s6372_s6 + $0x38] sm:$0xff]   ;;  %s6305_s17 = scalar_lea.hbm %s6374_s8, %s4419_s30  ;;  %s4688_s14 = scalar_lea.vmem %s4687_s13, 4096 }
  0x5b   : > { %v1169_v56 = vcombine.low %v1161_v14, %v1168_v27  ;;  %2094 = vperm.xlu1 %4613, %v1993_v52   ;;  %4503 = vmatprep.subr.bf16.mxu1 %v4644_v7  ;;  %v2128_v39 = vunpack.c.l.s4 %v4781_v38  ;;  %v4782_v40 = vmov 1414812756   ;;  %v4783_v42 = vmov 1987475062   ;;  %p4689_p4 = scmp.lt.s32.totalorder %s6307_s9, %s4687_s13  ;;  %p4690_p5 = scmp.lt.s32.totalorder %s4688_s14, %s4682_s22 }
  0x5c   : > { %v1185_v57 = vrot.slane %v1171_v53, %v4960_v26  ;;  %4492 = vmatmul.mubr.bf16.gmra.mrb[16].mxu0 %v1227_v54  ;;  %v1194_v58 = vrot.slane %v1187_v34, %v4960_v26  ;;  %v2135_v41 = vunpack.c.l.s4 %v4782_v40  ;;  %v2142_v43 = vunpack.c.l.s4 %v4783_v42  ;;  %v5416_v42 = vld [vmem:[%s6369_s3] ss:$0 sm:$0xff] }
  0x5d   : > { %2110 = vperm.xlu0 %4612, %v1997_v55   ;;  %v2122_v45 = vunpack.c.0.s8 %v2121_v37  ;;  %v2129_v25 = vunpack.c.0.s8 %v2128_v39  ;;  %v3621_v1 = vsub.s32 2, %v4927_v10  ;;  %p4691_p6 = por %p4690_p5, %p4689_p4 }
  0x5e   : > { %v1186_v60 = vcombine.low %v1178_v30, %v1185_v57  ;;  %v1229_v35 = vpack.c.bf16 %v1194_v58, %v1194_v58  ;;  %4504 = vmatpush3.bf16.msra.mxu1 %v4644_v7  ;;  %v2136_v33 = vunpack.c.0.s8 %v2135_v41  ;;  %v2143_v47 = vunpack.c.0.s8 %v2142_v43 }
  0x5f   : > { %2114 = vperm.xlu1 %4613, %v1998_v59   ;;  %4505 = vmatprep.subr.bf16.mxu1 %v4645_v11  ;;  %v5221_v22 = vsub.s32 %v2122_v45, %v4927_v10  ;;  %v5224_v48 = vsub.s32 %v2129_v25, %v4927_v10  ;;  %v3510_v25 = vsub.s32 0, %v4927_v10  ;;  %v5344_v45 = vld [vmem:[%s6370_s4] sm:$0xff]  ;;  %v3674_v7 = vsub.s32 3, %v4927_v10  ;;  %p4692_p7 = pnand %p4691_p6, %p4685_p2 }
  0x60   : > { %v1228_v31 = vpack.c.bf16 %v1186_v60, %v1169_v56  ;;  %v5227_v49 = vsub.s32 %v2136_v33, %v4927_v10  ;;  %v5230_v50 = vsub.s32 %v2143_v47, %v4927_v10  ;;  %6391 = vst [vmem:[#allocation8_spill] sm:$0xff] %v5344_v45  ;;  %v3831_v33 = vsub.s32 6, %v4927_v10 }
  0x61   : > { %2106 = vperm.xlu0 %4612, %v1996_v19  }
  0x62   : > { %4495 = vmatprep.mubr.bf16.mxu0 %v1228_v31  ;;  %4506 = vmatpush3.bf16.msra.mxu1 %v4645_v11  ;;  %v3726_v31 = vsub.s32 4, %v4927_v10  ;;  %v5466_v53 = vrot.slane %v5344_v45, %v3831_v33 }
  0x63   : > { %2118 = vperm.xlu1 %4613, %v1999_v28   ;;  %4507 = vmatprep.subr.bf16.mxu1 %v4646_v16 }
  0x64   : > { %4496 = vmatmul.mubr.bf16.gmra.mrb[20].mxu0 %v1229_v35  ;;  %v5448_v35 = vrot.slane %v5344_v45, %v3674_v7  ;;  %v3778_v7 = vsub.s32 5, %v4927_v10  ;;  %6395 = vst [vmem:[#allocation12_spill] sm:$0xff] %v5466_v53 }
  0x66   : > { %4508 = vmatpush3.bf16.msra.mxu1 %v4646_v16  ;;  %v5369_v16 = vrot.slane %v5344_v45, %v3510_v25  ;;  %v3569_v25 = vsub.s32 1, %v4927_v10  ;;  %6394 = vst [vmem:[#allocation11_spill] sm:$0xff] %v5448_v35 }
  0x67   : > { %4509 = vmatprep.subr.bf16.mxu1 %v4647_v20 }
  0x6a   : > { %4510 = vmatpush3.bf16.msra.mxu1 %v4647_v20 }
  0x6b   : > { %4511 = vmatprep.subr.bf16.mxu1 %v4648_v32 }
  0x6e   : > { %4512 = vmatpush3.bf16.msra.mxu1 %v4648_v32 }
  0x6f   : > { %4513 = vmatprep.subr.bf16.mxu1 %v4649_v44 }
  0x72   : > { %4514 = vmatpush3.bf16.msra.mxu1 %v4649_v44 }
  0xa6   : > { %v5156_v61 = vpop.permute.xlu0 %2002 }
  0xa7   : > { %v2126_v27 = vrot.slane %v5156_v61, %v5221_v22 }
  0xa9   : > { %v5158_v62 = vpop.permute.xlu1 %2014 }
  0xaa   : > { %v5160_v63 = vpop.permute.xlu0 %2006 }
  0xad   : > { %v5162_v0 = vpop.permute.xlu1 %2018 }
  0xae   : > { %v5167_v2 = vpop.permute.xlu0 %2026 }
  0xb1   : > { %v5169_v23 = vpop.permute.xlu1 %2030 }
  0xb2   : > { %v5174_v3 = vpop.permute.xlu0 %2010 }
  0xb3   : > { %v2182_v39 = vrot.slane %v5174_v3, %v5221_v22  ;;  %v6399_v3 = vrot.slane %v5158_v62, %v5224_v48 }
  0xb5   : > { %v5176_v4 = vpop.permute.xlu1 %2022 }
  0xb6   : > { %v5178_v5 = vpop.permute.xlu0 %2038 }
  0xb9   : > { %v5180_v6 = vpop.permute.xlu1 %2042 }
  0xba   : > { %v5185_v8 = vpop.permute.xlu0 %2034 }
  0xbd   : > { %v5187_v9 = vpop.permute.xlu1 %2050 }
  0xbe   : > { %v5192_v12 = vpop.permute.xlu0 %2054 }
  0xc1   : > { %v5194_v15 = vpop.permute.xlu1 %2046 }
  0xc4   : > { %v5199_v17 = vpop.permute.xlu0 %2062 }
  0xc5   : > { %v5201_v18 = vpop.permute.xlu1 %2066 }
  0xc8   : > { %v5206_v24 = vpop.permute.xlu0 %2058 }
  0xc9   : > { %v5211_v21 = vpop.permute.xlu1 %2074 }
  0xcc   : > { %v5216_v46 = vpop.permute.xlu0 %2078 }
  0xce   : > { %v5218_v13 = vpop.permute.xlu1 %2070 }
  0xd0   : > { %v5232_v51 = vpop.permute.xlu0 %2086 }
  0xd2   : > { %v5234_v14 = vpop.permute.xlu1 %2090 }
  0xd4   : > { %v5270_v29 = vpop.permute.xlu0 %2082 }
  0xd6   : > { %v5280_v32 = vpop.permute.xlu1 %2098 }
  0xd8   : > { %v5322_v11 = vpop.permute.xlu0 %2102 }
  0xda   : > { %v5330_v43 = vpop.permute.xlu1 %2094 }
  0xdc   : > { %v5379_v41 = vpop.permute.xlu0 %2110 }
  0xdd   : > { %6392 = vst [vmem:[#allocation9_spill] sm:$0xff] %v5379_v41 }
  0xde   : > { %v5389_v47 = vpop.permute.xlu1 %2114 }
  0xe0   : > { %v5435_v20 = vpop.permute.xlu0 %2106 }
  0xe1   : > { %6393 = vst [vmem:[#allocation10_spill] sm:$0xff] %v5435_v20 }
  0xe2   : > { %v5440_v37 = vpop.permute.xlu1 %2118 }
 0x10e   : > { %v4477_v36 = vpop.f32.mrb[0].mxu0 }
 0x10f   : > { %v1344_v44 = vadd.f32 %v4477_v36, %v5416_v42  ;;  %v1335_v38 = vpop.f32.mrb[1].mxu0  ;;  %v5463_v36 = vrot.slane %v5344_v45, %v3621_v1 }
 0x110   : > { %v1336_v40 = vadd.f32 %v5416_v42, %v1335_v38  ;;  %v4478_v60 = vpop.f32.mrb[2].mxu0 }
 0x111   : > { %v1431_v59 = vmax.f32 %v1344_v44, 0.0  ;;  %v1347_v58 = vadd.f32 %v4478_v60, %v5416_v42  ;;  %v1338_v57 = vpop.f32.mrb[3].mxu0  ;;  %v5460_v44 = vrot.slane %v5344_v45, %v3569_v25 }
 0x112   : > { %v1429_v19 = vmax.f32 %v1336_v40, 0.0  ;;  %v1339_v38 = vadd.f32 %v5416_v42, %v1338_v57 }
 0x113   : > { %v1454_v30 = vmin.f32 %v1431_v59, 6.0  ;;  %v1432_v56 = vmax.f32 %v1347_v58, 0.0  ;;  %v5471_v59 = vrot.slane %v5344_v45, %v3726_v31 }
 0x114   : > { %v1452_v60 = vmin.f32 %v1429_v19, 6.0  ;;  %v1430_v55 = vmax.f32 %v1339_v38, 0.0  ;;  %v5475_v19 = vrot.slane %v5344_v45, %v3778_v7 }
 0x115   : > { %v1532_v28 = vcombine.high %v1454_v30, %v1454_v30  ;;  %v1539_v57 = vrot.slane %v1454_v30, %v4960_v26  ;;  %v1455_v52 = vmin.f32 %v1432_v56, 6.0  ;;  %6396 = vst [vmem:[#allocation13_spill] sm:$0xff] %v5471_v59 }
 0x116   : > { %v1498_v58 = vcombine.high %v1452_v60, %v1452_v60  ;;  %v1505_v25 = vrot.slane %v1452_v60, %v4960_v26  ;;  %v1453_v54 = vmin.f32 %v1430_v55, 6.0  ;;  %v4481_v1 = vpop.f32.mrb[4].mxu0  ;;  %6397 = vst [vmem:[#allocation14_spill] sm:$0xff] %v5475_v19 }
 0x117   : > { %v1546_v33 = vrot.slane %v1532_v28, %v4960_v26  ;;  %v1547_v38 = vcombine.high %v1539_v57, %v1539_v57  ;;  %v2848_v40 = vmul.f32 %v2182_v39, %v1539_v57  ;;  %v1549_v30 = vcombine.high %v1455_v52, %v1455_v52  ;;  %v1351_v56 = vpop.f32.mrb[5].mxu0 }
 0x118   : > { %v1512_v31 = vrot.slane %v1498_v58, %v4960_v26  ;;  %v1513_v34 = vcombine.high %v1505_v25, %v1505_v25  ;;  %v2840_v55 = vmul.f32 %v2126_v27, %v1505_v25  ;;  %v1556_v60 = vrot.slane %v1455_v52, %v4960_v26  ;;  %v4482_v7 = vpop.f32.mrb[6].mxu0 }
 0x119   : > { %v1548_v53 = vcombine.high %v1546_v33, %v1546_v33  ;;  %v6398_v28 = vrot.slane %v5158_v62, %v5221_v22  ;;  %v2850_v39 = vmul.f32 %v6399_v3, %v1546_v33  ;;  %4394 = vst.sshfl [vmem:[#allocation2 + $0x10] sm:$0x3 pattern:$0x76325410] %v2848_v40  ;;  %v1563_v57 = vrot.slane %v1549_v30, %v4960_v26  ;;  %v1354_v58 = vpop.f32.mrb[7].mxu0 }
 0x11a   : > { %v1514_v45 = vcombine.high %v1512_v31, %v1512_v31  ;;  %v6400_v27 = vrot.slane %v5156_v61, %v5224_v48  ;;  %v6401_v52 = vrot.slane %v5156_v61, %v5227_v49  ;;  %v1564_v59 = vcombine.high %v1556_v60, %v1556_v60 }
 0x11b   : > { %v2849_v19 = vmul.f32 %v6398_v28, %v1547_v38  ;;  %v1565_v38 = vcombine.high %v1563_v57, %v1563_v57  ;;  %v6402_v28 = vrot.slane %v5158_v62, %v5227_v49  ;;  %v6403_v40 = vrot.slane %v5158_v62, %v5230_v50 }
 0x11c   : > { %v2841_v25 = vmul.f32 %v6400_v27, %v1513_v34  ;;  %v2842_v10 = vmul.f32 %v6401_v52, %v1512_v31  ;;  %v6404_v3 = vrot.slane %v5156_v61, %v5230_v50  ;;  %v6405_v27 = vrot.slane %v5162_v0, %v5221_v22 }
 0x11d   : > { %v3061_v35 = vcombine.low %v2849_v19, %v2850_v39  ;;  %v2851_v33 = vmul.f32 %v6402_v28, %v1548_v53  ;;  %v2852_v30 = vmul.f32 %v6403_v40, %v1556_v60  ;;  %v6406_v19 = vrot.slane %v5162_v0, %v5224_v48 }
 0x11e   : > { %v2843_v41 = vmul.f32 %v6404_v3, %v1514_v45  ;;  %v3020_v34 = vcombine.low %v2840_v55, %v2841_v25  ;;  %v2853_v31 = vmul.f32 %v6405_v27, %v1564_v59  ;;  %v1515_v28 = vcombine.high %v1453_v54, %v1453_v54  ;;  %v4485_v55 = vpop.f32.mrb[8].mxu0 }
 0x11f   : > { %v2854_v39 = vmul.f32 %v6406_v19, %v1563_v57  ;;  %v3069_v52 = vrot.slane %v3061_v35, %v4960_v26  ;;  %v3062_v53 = vcombine.low %v2851_v33, %v2852_v30  ;;  %v1522_v62 = vrot.slane %v1453_v54, %v4960_v26  ;;  %v5523_v33 = vpop.f32.mrb[9].mxu0 }
 0x120   : > { %v3021_v60 = vcombine.low %v2842_v10, %v2843_v41  ;;  %v3028_v40 = vrot.slane %v3020_v34, %v4960_v26  ;;  %v1360_v45 = vadd.f32 %v4481_v1, %v5416_v42  ;;  %v1529_v59 = vrot.slane %v1515_v28, %v4960_v26  ;;  %v5530_v30 = vpop.f32.mrb[10].mxu0 }
 0x121   : > { %v3078_v61 = vcombine.low %v2853_v31, %v2854_v39  ;;  %v3076_v25 = vrot.slane %v3062_v53, %v4960_v26  ;;  %v1530_v3 = vcombine.high %v1522_v62, %v1522_v62  ;;  %v6407_v57 = vrot.slane %v5160_v63, %v5221_v22  ;;  %v5540_v28 = vpop.f32.mrb[11].mxu0 }
 0x122   : > { %v3035_v54 = vrot.slane %v3021_v60, %v4960_v26  ;;  %v1435_v41 = vmax.f32 %v1360_v45, 0.0  ;;  %v1352_v1 = vadd.f32 %v5416_v42, %v1351_v56  ;;  %v1531_v27 = vcombine.high %v1529_v59, %v1529_v59 }
 0x123   : > { %v2844_v35 = vmul.f32 %v6407_v57, %v1522_v62  ;;  %v5527_v10 = vrot.slane %v3078_v61, %v4960_v26  ;;  %v5532_v34 = vcombine.low %v3069_v52, %v3076_v25  ;;  %v6409_v31 = vrot.slane %v5160_v63, %v5224_v48 }
 0x124   : > { %v6410_v39 = vrot.slane %v5160_v63, %v5227_v49  ;;  %v5542_v62 = vcombine.low %v3028_v40, %v3035_v54  ;;  %v1458_v60 = vmin.f32 %v1435_v41, 6.0  ;;  %v1433_v61 = vmax.f32 %v1352_v1, 0.0 }
 0x125   : > { %6408 = vst [vmem:[#allocation15_spill] sm:$0xff] %v5532_v34  ;;  %v2845_v19 = vmul.f32 %v6409_v31, %v1530_v3  ;;  %v6411_v56 = vrot.slane %v5162_v0, %v5227_v49  ;;  %3463 = vst [vmem:[#allocation2 + $0x18] sm:$0xff] %v5532_v34  ;;  %v6412_v45 = vrot.slane %v5160_v63, %v5230_v50 }
 0x126   : > { %v2846_v53 = vmul.f32 %v6410_v39, %v1529_v59  ;;  %v1363_v57 = vadd.f32 %v4482_v7, %v5416_v42  ;;  %v1355_v59 = vadd.f32 %v5416_v42, %v1354_v58  ;;  %3460 = vst [vmem:[#allocation2] sm:$0xff] %v5542_v62  ;;  %v1600_v40 = vcombine.high %v1458_v60, %v1458_v60 }
 0x127   : > { %v2855_v52 = vmul.f32 %v6411_v56, %v1565_v38  ;;  %v2847_v25 = vmul.f32 %v6412_v45, %v1531_v27  ;;  %v3037_v3 = vcombine.low %v2844_v35, %v2845_v19  ;;  %v1607_v54 = vrot.slane %v1458_v60, %v4960_v26 }
 0x128   : > { %v1456_v41 = vmin.f32 %v1433_v61, 6.0  ;;  %v1376_v1 = vadd.f32 %v4485_v55, %v5416_v42  ;;  %v1436_v39 = vmax.f32 %v1363_v57, 0.0  ;;  %v1434_v56 = vmax.f32 %v1355_v59, 0.0  ;;  %v5563_v55 = vpop.f32.mrb[12].mxu0 }
 0x129   : > { %v3038_v38 = vcombine.low %v2846_v53, %v2847_v25  ;;  %v3045_v31 = vrot.slane %v3037_v3, %v4960_v26  ;;  %v1614_v63 = vrot.slane %v1600_v40, %v4960_v26  ;;  %v1615_v35 = vcombine.high %v1607_v54, %v1607_v54 }
 0x12a   : > { %v6413_v7 = vrot.slane %v5169_v23, %v5227_v49  ;;  %v1566_v27 = vcombine.high %v1456_v41, %v1456_v41  ;;  %v1573_v60 = vrot.slane %v1456_v41, %v4960_v26  ;;  %v1459_v61 = vmin.f32 %v1436_v39, 6.0 }
 0x12b   : > { %v3052_v19 = vrot.slane %v3038_v38, %v4960_v26  ;;  %v1457_v45 = vmin.f32 %v1434_v56, 6.0  ;;  %v1616_v53 = vcombine.high %v1614_v63, %v1614_v63  ;;  %v6414_v25 = vrot.slane %v5169_v23, %v5230_v50 }
 0x12c   : > { %v2864_v58 = vmul.f32 %v6413_v7, %v1607_v54  ;;  %v6415_v57 = vrot.slane %v5185_v8, %v5221_v22  ;;  %v1580_v40 = vrot.slane %v1566_v27, %v4960_v26  ;;  %v5572_v54 = vpop.f32.mrb[13].mxu0  ;;  %v1581_v41 = vcombine.high %v1573_v60, %v1573_v60 }
 0x12d   : > { %v2865_v3 = vmul.f32 %v6414_v25, %v1615_v35  ;;  %v5574_v38 = vcombine.low %v3045_v31, %v3052_v19  ;;  %v6416_v39 = vrot.slane %v5162_v0, %v5230_v50  ;;  %v1617_v7 = vcombine.high %v1459_v61, %v1459_v61  ;;  %v5579_v34 = vpop.f32.mrb[14].mxu0 }
 0x12e   : > { %v2866_v59 = vmul.f32 %v6415_v57, %v1614_v63  ;;  %v1582_v35 = vcombine.high %v1580_v40, %v1580_v40  ;;  %v6417_v8 = vrot.slane %v5167_v2, %v5221_v22  ;;  %v1624_v27 = vrot.slane %v1459_v61, %v4960_v26  ;;  %v5585_v25 = vpop.f32.mrb[15].mxu0 }
 0x12f   : > { %v2856_v56 = vmul.f32 %v6416_v39, %v1573_v60  ;;  %v3120_v20 = vcombine.low %v2864_v58, %v2865_v3  ;;  %3461 = vst [vmem:[#allocation2 + $0x8] sm:$0xff] %v5574_v38  ;;  %v6418_v0 = vrot.slane %v5176_v4, %v5221_v22  ;;  %v1631_v60 = vrot.slane %v1617_v7, %v4960_v26 }
 0x130   : > { %4396 = vst.sshfl [vmem:[#allocation2 + $0x40] sm:$0x3 pattern:$0x76325410] %v2866_v59  ;;  %v2858_v63 = vmul.f32 %v6417_v8, %v1580_v40  ;;  %v6419_v58 = vrot.slane %v5178_v5, %v5221_v22  ;;  %v6420_v61 = vrot.slane %v5167_v2, %v5224_v48  ;;  %v1632_v40 = vcombine.high %v1624_v27, %v1624_v27 }
 0x131   : > { %v2857_v31 = vmul.f32 %v6418_v0, %v1581_v41  ;;  %v3079_v19 = vcombine.low %v2855_v52, %v2856_v56  ;;  %v3134_v57 = vrot.slane %v3120_v20, %v4960_v26  ;;  %v6421_v39 = vrot.slane %v5178_v5, %v5224_v48 }
 0x132   : > { %v2867_v3 = vmul.f32 %v6419_v58, %v1616_v53  ;;  %v2859_v59 = vmul.f32 %v6420_v61, %v1582_v35  ;;  %v1633_v52 = vcombine.high %v1631_v60, %v1631_v60  ;;  %v6422_v41 = vrot.slane %v5178_v5, %v5230_v50 }
 0x133   : > { %v2868_v8 = vmul.f32 %v6421_v39, %v1624_v27  ;;  %v3093_v4 = vrot.slane %v3079_v19, %v4960_v26  ;;  %4395 = vst.sshfl [vmem:[#allocation2 + $0x28] sm:$0x3 pattern:$0x76325410] %v2857_v31  ;;  %v1583_v53 = vcombine.high %v1457_v45, %v1457_v45  ;;  %v6423_v20 = vrot.slane %v5178_v5, %v5227_v49 }
 0x134   : > { %v2870_v56 = vmul.f32 %v6422_v41, %v1631_v60  ;;  %v3102_v7 = vcombine.low %v2858_v63, %v2859_v59  ;;  %v1590_v58 = vrot.slane %v1457_v45, %v4960_v26  ;;  %v1439_v31 = vmax.f32 %v1376_v1, 0.0 }
 0x135   : > { %v2869_v0 = vmul.f32 %v6423_v20, %v1632_v40  ;;  %v3143_v35 = vcombine.low %v2867_v3, %v2868_v8  ;;  %v5611_v61 = vcombine.low %v5527_v10, %v3093_v4  ;;  %v1597_v27 = vrot.slane %v1583_v53, %v4960_v26 }
 0x136   : > { %v1368_v19 = vadd.f32 %v5416_v42, %v5523_v33  ;;  %v3110_v60 = vrot.slane %v3102_v7, %v4960_v26  ;;  %v1598_v59 = vcombine.high %v1590_v58, %v1590_v58  ;;  %v6424_v45 = vrot.slane %v5167_v2, %v5227_v49 }
 0x137   : > { %v3144_v39 = vcombine.low %v2869_v0, %v2870_v56  ;;  %v3151_v63 = vrot.slane %v3143_v35, %v4960_v26  ;;  %3464 = vst [vmem:[#allocation2 + $0x20] sm:$0xff] %v5611_v61  ;;  %v1599_v5 = vcombine.high %v1597_v27, %v1597_v27  ;;  %v6425_v3 = vrot.slane %v5169_v23, %v5221_v22 }
 0x138   : > { %v2860_v10 = vmul.f32 %v6424_v45, %v1590_v58  ;;  %v1462_v40 = vmin.f32 %v1439_v31, 6.0  ;;  %v6426_v8 = vrot.slane %v5167_v2, %v5230_v50  ;;  %v1437_v41 = vmax.f32 %v1368_v19, 0.0 }
 0x139   : > { %v2862_v1 = vmul.f32 %v6425_v3, %v1597_v27  ;;  %v3158_v33 = vrot.slane %v3144_v39, %v4960_v26  ;;  %v6427_v56 = vrot.slane %v5180_v6, %v5221_v22  ;;  %v6428_v7 = vrot.slane %v5169_v23, %v5224_v48  ;;  %v5638_v27 = vpop.f32.mrb[16].mxu0 }
 0x13a   : > { %v2861_v4 = vmul.f32 %v6426_v8, %v1598_v59  ;;  %v1668_v0 = vcombine.high %v1462_v40, %v1462_v40  ;;  %v1675_v35 = vrot.slane %v1462_v40, %v4960_v26  ;;  %v1379_v58 = vadd.f32 %v5530_v30, %v5416_v42 }
 0x13b   : > { %v2871_v53 = vmul.f32 %v6427_v56, %v1633_v52  ;;  %v2863_v20 = vmul.f32 %v6428_v7, %v1599_v5  ;;  %v5640_v31 = vcombine.low %v3151_v63, %v3158_v33  ;;  %v1460_v19 = vmin.f32 %v1437_v41, 6.0  ;;  %v5644_v52 = vpop.f32.mrb[17].mxu0 }
 0x13c   : > { %v3103_v2 = vcombine.low %v2860_v10, %v2861_v4  ;;  %v1371_v39 = vadd.f32 %v5416_v42, %v5540_v28  ;;  %v1682_v23 = vrot.slane %v1668_v0, %v4960_v26  ;;  %v1683_v5 = vcombine.high %v1675_v35, %v1675_v35  ;;  %v5650_v30 = vpop.f32.mrb[18].mxu0 }
 0x13d   : > { %v3119_v59 = vcombine.low %v2862_v1, %v2863_v20  ;;  %v6429_v45 = vrot.slane %v5192_v12, %v5221_v22  ;;  %3469 = vst [vmem:[#allocation2 + $0x48] sm:$0xff] %v5640_v31  ;;  %v1634_v10 = vcombine.high %v1460_v19, %v1460_v19  ;;  %v1641_v40 = vrot.slane %v1460_v19, %v4960_v26  ;;  %v5655_v33 = vpop.f32.mrb[19].mxu0 }
 0x13e   : > { %v3117_v63 = vrot.slane %v3103_v2, %v4960_v26  ;;  %v1440_v28 = vmax.f32 %v1379_v58, 0.0  ;;  %v1684_v8 = vcombine.high %v1682_v23, %v1682_v23  ;;  %v6430_v4 = vrot.slane %v5192_v12, %v5224_v48 }
 0x13f   : > { %v2880_v3 = vmul.f32 %v6429_v45, %v1675_v35  ;;  %v3127_v1 = vrot.slane %v3119_v59, %v4960_v26  ;;  %v6431_v56 = vrot.slane %v5192_v12, %v5227_v49  ;;  %v1648_v0 = vrot.slane %v1634_v10, %v4960_v26 }
 0x140   : > { %v2881_v41 = vmul.f32 %v6430_v4, %v1683_v5  ;;  %v5664_v20 = vcombine.low %v3110_v60, %v3117_v63  ;;  %v1649_v35 = vcombine.high %v1641_v40, %v1641_v40  ;;  %v6432_v58 = vrot.slane %v5180_v6, %v5224_v48 }
 0x141   : > { %v2882_v7 = vmul.f32 %v6431_v56, %v1682_v23  ;;  %v5670_v19 = vcombine.low %v3127_v1, %v3134_v57  ;;  %v6433_v59 = vrot.slane %v5192_v12, %v5230_v50  ;;  %v1463_v4 = vmin.f32 %v1440_v28, 6.0  ;;  %v5685_v28 = vpop.f32.mrb[20].mxu0 }
 0x142   : > { %v2872_v2 = vmul.f32 %v6432_v58, %v1641_v40  ;;  %v3201_v5 = vcombine.low %v2880_v3, %v2881_v41  ;;  %3466 = vst [vmem:[#allocation2 + $0x30] sm:$0xff] %v5664_v20  ;;  %v1650_v23 = vcombine.high %v1648_v0, %v1648_v0  ;;  %v6434_v60 = vrot.slane %v5180_v6, %v5227_v49 }
 0x143   : > { %v2883_v45 = vmul.f32 %v6433_v59, %v1684_v8  ;;  %v6435_v10 = vrot.slane %v5180_v6, %v5230_v50  ;;  %3467 = vst [vmem:[#allocation2 + $0x38] sm:$0xff] %v5670_v19  ;;  %v1685_v1 = vcombine.high %v1463_v4, %v1463_v4  ;;  %v1692_v3 = vrot.slane %v1463_v4, %v4960_v26 }
 0x144   : > { %v2873_v63 = vmul.f32 %v6434_v60, %v1649_v35  ;;  %v3160_v40 = vcombine.low %v2871_v53, %v2872_v2  ;;  %v3209_v12 = vrot.slane %v3201_v5, %v4960_v26  ;;  %v6436_v8 = vrot.slane %v5194_v15, %v5221_v22 }
 0x145   : > { %v2874_v56 = vmul.f32 %v6435_v10, %v1648_v0  ;;  %v3202_v57 = vcombine.low %v2882_v7, %v2883_v45  ;;  %v1438_v6 = vmax.f32 %v1371_v39, 0.0  ;;  %v5691_v0 = vpop.f32.mrb[21].mxu0  ;;  %v1699_v7 = vrot.slane %v1685_v1, %v4960_v26 }
 0x146   : > { %v2875_v41 = vmul.f32 %v6436_v8, %v1650_v23  ;;  %v3168_v58 = vrot.slane %v3160_v40, %v4960_v26  ;;  %v1700_v2 = vcombine.high %v1692_v3, %v1692_v3  ;;  %v6437_v59 = vrot.slane %v5206_v24, %v5221_v22  ;;  %v4498_v5 = vpop.f32.mrb[22].mxu0 }
 0x147   : > { %v3161_v35 = vcombine.low %v2873_v63, %v2874_v56  ;;  %v3216_v53 = vrot.slane %v3202_v57, %v4960_v26  ;;  %v1461_v15 = vmin.f32 %v1438_v6, 6.0  ;;  %v1392_v23 = vadd.f32 %v5563_v55, %v5416_v42  ;;  %v5703_v60 = vpop.f32.mrb[23].mxu0 }
 0x148   : > { %v2884_v45 = vmul.f32 %v6437_v59, %v1692_v3  ;;  %4397 = vst.sshfl [vmem:[#allocation2 + $0x58] sm:$0x3 pattern:$0x76325410] %v2875_v41  ;;  %v1384_v39 = vadd.f32 %v5416_v42, %v5572_v54  ;;  %v1701_v10 = vcombine.high %v1699_v7, %v1699_v7  ;;  %v6438_v24 = vrot.slane %v5199_v17, %v5221_v22 }
 0x149   : > { %v3175_v4 = vrot.slane %v3161_v35, %v4960_v26  ;;  %v5705_v63 = vcombine.low %v3209_v12, %v3216_v53  ;;  %v6439_v40 = vrot.slane %v5199_v17, %v5224_v48  ;;  %v1651_v55 = vcombine.high %v1461_v15, %v1461_v15 }
 0x14a   : > { %v2885_v56 = vmul.f32 %v6438_v24, %v1700_v2  ;;  %4398 = vst.sshfl [vmem:[#allocation2 + $0x70] sm:$0x3 pattern:$0x76325410] %v2884_v45  ;;  %v1658_v3 = vrot.slane %v1461_v15, %v4960_v26  ;;  %v1443_v54 = vmax.f32 %v1392_v23, 0.0  ;;  %v1441_v8 = vmax.f32 %v1384_v39, 0.0 }
 0x14b   : > { %v2886_v57 = vmul.f32 %v6439_v40, %v1699_v7  ;;  %v5713_v1 = vcombine.low %v3168_v58, %v3175_v4  ;;  %3473 = vst [vmem:[#allocation2 + $0x68] sm:$0xff] %v5705_v63  ;;  %v6440_v41 = vrot.slane %v5199_v17, %v5227_v49  ;;  %v1395_v6 = vadd.f32 %v5579_v34, %v5416_v42 }
 0x14c   : > { %v1665_v58 = vrot.slane %v1651_v55, %v4960_v26  ;;  %v1666_v53 = vcombine.high %v1658_v3, %v1658_v3  ;;  %v6441_v7 = vrot.slane %v5187_v9, %v5221_v22  ;;  %v1466_v59 = vmin.f32 %v1443_v54, 6.0 }
 0x14d   : > { %v3225_v12 = vcombine.low %v2885_v56, %v2886_v57  ;;  %v2887_v35 = vmul.f32 %v6440_v41, %v1701_v10  ;;  %3470 = vst [vmem:[#allocation2 + $0x50] sm:$0xff] %v5713_v1  ;;  %v1464_v5 = vmin.f32 %v1441_v8, 6.0  ;;  %v1444_v4 = vmax.f32 %v1395_v6, 0.0 }
 0x14e   : > { %v2876_v2 = vmul.f32 %v6441_v7, %v1658_v3  ;;  %v1387_v15 = vadd.f32 %v5416_v42, %v5585_v25  ;;  %v1667_v23 = vcombine.high %v1665_v58, %v1665_v58  ;;  %v6442_v34 = vrot.slane %v5187_v9, %v5224_v48 }
 0x14f   : > { %v3233_v45 = vrot.slane %v3225_v12, %v4960_v26  ;;  %v6443_v10 = vrot.slane %v5187_v9, %v5227_v49  ;;  %v1736_v56 = vcombine.high %v1466_v59, %v1466_v59  ;;  %v1743_v40 = vrot.slane %v1466_v59, %v4960_v26 }
 0x150   : > { %v2877_v39 = vmul.f32 %v6442_v34, %v1666_v53  ;;  %v1702_v57 = vcombine.high %v1464_v5, %v1464_v5  ;;  %v1709_v55 = vrot.slane %v1464_v5, %v4960_v26  ;;  %v1467_v3 = vmin.f32 %v1444_v4, 6.0 }
 0x151   : > { %v2878_v24 = vmul.f32 %v6443_v10, %v1665_v58  ;;  %v6444_v54 = vrot.slane %v5187_v9, %v5230_v50  ;;  %v1750_v8 = vrot.slane %v1736_v56, %v4960_v26  ;;  %v1442_v41 = vmax.f32 %v1387_v15, 0.0 }
 0x152   : > { %v3184_v12 = vcombine.low %v2876_v2, %v2877_v39  ;;  %v1751_v6 = vcombine.high %v1743_v40, %v1743_v40  ;;  %v6445_v53 = vrot.slane %v5211_v21, %v5227_v49  ;;  %v1716_v7 = vrot.slane %v1702_v57, %v4960_v26 }
 0x153   : > { %v2879_v25 = vmul.f32 %v6444_v54, %v1667_v23  ;;  %v1717_v59 = vcombine.high %v1709_v55, %v1709_v55  ;;  %v1752_v4 = vcombine.high %v1750_v8, %v1750_v8  ;;  %v6446_v9 = vrot.slane %v5216_v46, %v5221_v22 }
 0x154   : > { %v2896_v58 = vmul.f32 %v6445_v53, %v1743_v40  ;;  %v3192_v5 = vrot.slane %v3184_v12, %v4960_v26  ;;  %v6447_v2 = vrot.slane %v5211_v21, %v5230_v50  ;;  %v1718_v39 = vcombine.high %v1716_v7, %v1716_v7 }
 0x155   : > { %v3185_v34 = vcombine.low %v2878_v24, %v2879_v25  ;;  %v2898_v23 = vmul.f32 %v6446_v9, %v1750_v8  ;;  %v6448_v10 = vrot.slane %v5199_v17, %v5230_v50  ;;  %v6449_v40 = vrot.slane %v5201_v18, %v5221_v22 }
 0x156   : > { %v2897_v15 = vmul.f32 %v6447_v2, %v1751_v6  ;;  %v6450_v54 = vrot.slane %v5216_v46, %v5224_v48  ;;  %v6451_v12 = vrot.slane %v5201_v18, %v5224_v48  ;;  %v1753_v6 = vcombine.high %v1467_v3, %v1467_v3 }
 0x157   : > { %v2888_v56 = vmul.f32 %v6448_v10, %v1709_v55  ;;  %v2889_v24 = vmul.f32 %v6449_v40, %v1717_v59  ;;  %v3199_v57 = vrot.slane %v3185_v34, %v4960_v26  ;;  %v1760_v17 = vrot.slane %v1467_v3, %v4960_v26 }
 0x158   : > { %v2899_v25 = vmul.f32 %v6450_v54, %v1752_v4  ;;  %v2890_v8 = vmul.f32 %v6451_v12, %v1716_v7  ;;  %v3267_v53 = vcombine.low %v2896_v58, %v2897_v15  ;;  %v1465_v55 = vmin.f32 %v1442_v41, 6.0 }
 0x159   : > { %v3226_v9 = vcombine.low %v2887_v35, %v2888_v56  ;;  %v5767_v2 = vcombine.low %v3192_v5, %v3199_v57  ;;  %v1767_v34 = vrot.slane %v1753_v6, %v4960_v26  ;;  %v1768_v54 = vcombine.high %v1760_v17, %v1760_v17 }
 0x15a   : > { %v3283_v10 = vcombine.low %v2898_v23, %v2899_v25  ;;  %v3242_v59 = vcombine.low %v2889_v24, %v2890_v8  ;;  %v3281_v40 = vrot.slane %v3267_v53, %v4960_v26  ;;  %v6452_v7 = vrot.slane %v5216_v46, %v5227_v49 }
 0x15b   : > { %v3240_v4 = vrot.slane %v3226_v9, %v4960_v26  ;;  %3472 = vst [vmem:[#allocation2 + $0x60] sm:$0xff] %v5767_v2  ;;  %v1769_v41 = vcombine.high %v1767_v34, %v1767_v34  ;;  %v6453_v58 = vrot.slane %v5270_v29, %v5221_v22  ;;  %v6454_v15 = vrot.slane %v5216_v46, %v5230_v50 }
 0x15c   : > { %v2900_v12 = vmul.f32 %v6452_v7, %v1760_v17  ;;  %v3291_v35 = vrot.slane %v3283_v10, %v4960_v26  ;;  %v3250_v3 = vrot.slane %v3242_v59, %v4960_v26  ;;  %v1719_v24 = vcombine.high %v1465_v55, %v1465_v55 }
 0x15d   : > { %v2902_v5 = vmul.f32 %v6453_v58, %v1767_v34  ;;  %v5781_v23 = vcombine.low %v3233_v45, %v3240_v4  ;;  %v2901_v56 = vmul.f32 %v6454_v15, %v1768_v54  ;;  %v1726_v57 = vrot.slane %v1465_v55, %v4960_v26 }
 0x15e   : > { %v6455_v25 = vrot.slane %v5201_v18, %v5227_v49  ;;  %v1408_v6 = vadd.f32 %v5638_v27, %v5416_v42  ;;  %v1400_v29 = vadd.f32 %v5416_v42, %v5644_v52  ;;  %v6456_v45 = vrot.slane %v5232_v51, %v5221_v22 }
 0x15f   : > { %4400 = vst.sshfl [vmem:[#allocation2 + $0xa0] sm:$0x3 pattern:$0x76325410] %v2902_v5  ;;  %3475 = vst [vmem:[#allocation2 + $0x78] sm:$0xff] %v5781_v23  ;;  %v3284_v46 = vcombine.low %v2900_v12, %v2901_v56  ;;  %v1733_v9 = vrot.slane %v1719_v24, %v4960_v26  ;;  %v1734_v17 = vcombine.high %v1726_v57, %v1726_v57 }
 0x160   : > { %v2891_v8 = vmul.f32 %v6455_v25, %v1718_v39  ;;  %v2903_v53 = vmul.f32 %v6456_v45, %v1769_v41  ;;  %v6457_v55 = vrot.slane %v5201_v18, %v5230_v50  ;;  %v1447_v10 = vmax.f32 %v1408_v6, 0.0 }
 0x161   : > { %v1445_v59 = vmax.f32 %v1400_v29, 0.0  ;;  %v1411_v27 = vadd.f32 %v5650_v30, %v5416_v42  ;;  %v1403_v52 = vadd.f32 %v5416_v42, %v5655_v33  ;;  %v3298_v34 = vrot.slane %v3284_v46, %v4960_v26 }
 0x162   : > { %v2892_v39 = vmul.f32 %v6457_v55, %v1726_v57  ;;  %v1735_v4 = vcombine.high %v1733_v9, %v1733_v9  ;;  %v6458_v54 = vrot.slane %v5218_v13, %v5221_v22  ;;  %v6459_v12 = vrot.slane %v5211_v21, %v5221_v22 }
 0x163   : > { %v1470_v58 = vmin.f32 %v1447_v10, 6.0  ;;  %v1468_v5 = vmin.f32 %v1445_v59, 6.0  ;;  %v1448_v15 = vmax.f32 %v1411_v27, 0.0  ;;  %v5813_v56 = vcombine.low %v3291_v35, %v3298_v34 }
 0x164   : > { %v2893_v7 = vmul.f32 %v6458_v54, %v1734_v17  ;;  %v2894_v18 = vmul.f32 %v6459_v12, %v1733_v9  ;;  %v3243_v41 = vcombine.low %v2891_v8, %v2892_v39  ;;  %v6460_v30 = vrot.slane %v5211_v21, %v5224_v48 }
 0x165   : > { %v1446_v24 = vmax.f32 %v1403_v52, 0.0  ;;  %v5820_v13 = vadd.f32 %v5685_v28, %v5416_v42  ;;  %v1804_v25 = vcombine.high %v1470_v58, %v1470_v58  ;;  %v1811_v8 = vrot.slane %v1470_v58, %v4960_v26  ;;  %3479 = vst [vmem:[#allocation2 + $0x98] sm:$0xff] %v5813_v56 }
 0x166   : > { %v2895_v33 = vmul.f32 %v6460_v30, %v1735_v4  ;;  %4399 = vst.sshfl [vmem:[#allocation2 + $0x88] sm:$0x3 pattern:$0x76325410] %v2893_v7  ;;  %v3257_v57 = vrot.slane %v3243_v41, %v4960_v26  ;;  %v1770_v6 = vcombine.high %v1468_v5, %v1468_v5  ;;  %v1777_v29 = vrot.slane %v1468_v5, %v4960_v26 }
 0x167   : > { %v1471_v45 = vmin.f32 %v1448_v15, 6.0  ;;  %v1469_v21 = vmin.f32 %v1446_v24, 6.0  ;;  %v1818_v9 = vrot.slane %v1804_v25, %v4960_v26  ;;  %v1819_v17 = vcombine.high %v1811_v8, %v1811_v8 }
 0x168   : > { %v3266_v35 = vcombine.low %v2894_v18, %v2895_v33  ;;  %v5826_v46 = vcombine.low %v3250_v3, %v3257_v57  ;;  %v6461_v28 = vrot.slane %v5280_v32, %v5221_v22  ;;  %v1784_v10 = vrot.slane %v1770_v6, %v4960_v26 }
 0x169   : > { %v1785_v59 = vcombine.high %v1777_v29, %v1777_v29  ;;  %v6462_v27 = vrot.slane %v5232_v51, %v5224_v48  ;;  %v1820_v3 = vcombine.high %v1818_v9, %v1818_v9  ;;  %v6463_v34 = vrot.slane %v5280_v32, %v5224_v48 }
 0x16a   : > { %v2912_v55 = vmul.f32 %v6461_v28, %v1811_v8  ;;  %v3274_v39 = vrot.slane %v3266_v35, %v4960_v26  ;;  %3476 = vst [vmem:[#allocation2 + $0x80] sm:$0xff] %v5826_v46  ;;  %v6464_v54 = vrot.slane %v5280_v32, %v5227_v49  ;;  %v1821_v12 = vcombine.high %v1471_v45, %v1471_v45 }
 0x16b   : > { %v2904_v52 = vmul.f32 %v6462_v27, %v1777_v29  ;;  %v2913_v4 = vmul.f32 %v6463_v34, %v1819_v17  ;;  %v1786_v41 = vcombine.high %v1784_v10, %v1784_v10  ;;  %v6465_v58 = vrot.slane %v5232_v51, %v5227_v49 }
 0x16c   : > { %v2914_v7 = vmul.f32 %v6464_v54, %v1818_v9  ;;  %v5844_v18 = vcombine.low %v3274_v39, %v3281_v40  ;;  %v6466_v15 = vrot.slane %v5232_v51, %v5230_v50  ;;  %v6467_v33 = vrot.slane %v5280_v32, %v5230_v50 }
 0x16d   : > { %v2905_v5 = vmul.f32 %v6465_v58, %v1785_v59  ;;  %v3348_v57 = vcombine.low %v2912_v55, %v2913_v4  ;;  %v3307_v25 = vcombine.low %v2903_v53, %v2904_v52  ;;  %v1828_v8 = vrot.slane %v1471_v45, %v4960_v26 }
 0x16e   : > { %v2906_v30 = vmul.f32 %v6466_v15, %v1784_v10  ;;  %v2915_v24 = vmul.f32 %v6467_v33, %v1820_v3  ;;  %3478 = vst [vmem:[#allocation2 + $0x90] sm:$0xff] %v5844_v18  ;;  %v1835_v6 = vrot.slane %v1821_v12, %v4960_v26  ;;  %v1787_v35 = vcombine.high %v1469_v21, %v1469_v21 }
 0x16f   : > { %v1794_v29 = vrot.slane %v1469_v21, %v4960_v26  ;;  %v3356_v51 = vrot.slane %v3348_v57, %v4960_v26  ;;  %v3315_v17 = vrot.slane %v3307_v25, %v4960_v26  ;;  %v1836_v28 = vcombine.high %v1828_v8, %v1828_v8 }
 0x170   : > { %v3308_v40 = vcombine.low %v2905_v5, %v2906_v30  ;;  %v3349_v9 = vcombine.low %v2914_v7, %v2915_v24  ;;  %v1837_v55 = vcombine.high %v1835_v6, %v1835_v6  ;;  %v6468_v53 = vrot.slane %v5322_v11, %v5221_v22 }
 0x171   : > { %v6469_v39 = vrot.slane %v5322_v11, %v5227_v49  ;;  %v6470_v21 = vrot.slane %v5322_v11, %v5224_v48  ;;  %v1801_v52 = vrot.slane %v1787_v35, %v4960_v26  ;;  %v1802_v3 = vcombine.high %v1794_v29, %v1794_v29 }
 0x172   : > { %v3322_v32 = vrot.slane %v3308_v40, %v4960_v26  ;;  %v2916_v45 = vmul.f32 %v6468_v53, %v1828_v8  ;;  %v3363_v59 = vrot.slane %v3349_v9, %v4960_v26  ;;  %v6471_v4 = vrot.slane %v5322_v11, %v5230_v50 }
 0x173   : > { %v2918_v10 = vmul.f32 %v6469_v39, %v1835_v6  ;;  %v2917_v27 = vmul.f32 %v6470_v21, %v1836_v28  ;;  %v6472_v7 = vrot.slane %v5234_v14, %v5221_v22  ;;  %v6473_v58 = vrot.slane %v5234_v14, %v5224_v48 }
 0x174   : > { %v5873_v34 = vcombine.low %v3315_v17, %v3322_v32  ;;  %v2919_v54 = vmul.f32 %v6471_v4, %v1837_v55  ;;  %v3364_v15 = vcombine.low %v3356_v51, %v3363_v59  ;;  %v1803_v33 = vcombine.high %v1801_v52, %v1801_v52  ;;  %v3551_v17 = vld [vmem:[#allocation2 + $0x1] sm:$0xff]  ;;  %v5905_v55 = vld [vmem:[%s6371_s5] ss:$0 sm:$0xff] }
 0x175   : > { %v2907_v12 = vmul.f32 %v6472_v7, %v1786_v41  ;;  %v2908_v5 = vmul.f32 %v6473_v58, %v1794_v29  ;;  %v3365_v30 = vcombine.low %v2916_v45, %v2917_v27  ;;  %v6474_v24 = vrot.slane %v5234_v14, %v5227_v49  ;;  %v3603_v4 = vld [vmem:[#allocation2 + $0x2] sm:$0xff] }
 0x176   : > { %3481 = vst [vmem:[#allocation2 + $0xa8] sm:$0xff] %v5873_v34  ;;  %v3366_v25 = vcombine.low %v2918_v10, %v2919_v54  ;;  %v6475_v11 = vrot.slane %v5234_v14, %v5230_v50  ;;  %v1451_v41 = vmax.f32 %v5820_v13, 0.0  ;;  %3484 = vst [vmem:[#allocation2 + $0xc0] sm:$0xff] %v3364_v15  ;;  %v6476_v35 = vrot.slane %v5330_v43, %v5221_v22 }
 0x177   : > { %v2909_v57 = vmul.f32 %v6474_v24, %v1802_v3  ;;  %v3324_v40 = vcombine.low %v2907_v12, %v2908_v5  ;;  %v3373_v6 = vrot.slane %v3365_v30, %v4960_v26  ;;  %v1416_v9 = vadd.f32 %v5416_v42, %v5691_v0 }
 0x178   : > { %v2910_v8 = vmul.f32 %v6475_v11, %v1801_v52  ;;  %v2911_v29 = vmul.f32 %v6476_v35, %v1803_v33  ;;  %v1419_v51 = vadd.f32 %v5416_v42, %v5703_v60  ;;  %v3380_v14 = vrot.slane %v3366_v25, %v4960_v26  ;;  %v3552_v60 = vld [vmem:[#allocation2 + $0x9] sm:$0xff] }
 0x179   : > { %v3332_v32 = vrot.slane %v3324_v40, %v4960_v26  ;;  %v1474_v13 = vmin.f32 %v1451_v41, 6.0  ;;  %v1449_v43 = vmax.f32 %v1416_v9, 0.0  ;;  %v3512_v0 = vmul.f32 %v5369_v16, %v5542_v62  ;;  %v3604_v33 = vld [vmem:[#allocation2 + $0xa] sm:$0xff] }
 0x17a   : > { %v3325_v28 = vcombine.low %v2909_v57, %v2910_v8  ;;  %4401 = vst.sshfl [vmem:[#allocation2 + $0xb8] sm:$0x3 pattern:$0x76325410] %v2911_v29  ;;  %v1450_v53 = vmax.f32 %v1419_v51, 0.0  ;;  %v3513_v42 = vmul.f32 %v5369_v16, %v5574_v38  ;;  %v3381_v45 = vcombine.low %v3373_v6, %v3380_v14  ;;  %v6479_v6 = vld [vmem:[#allocation10_spill] sm:$0xff] }
 0x17b   : > { %v1878_v10 = vrot.slane %v1474_v13, %v4960_v26  ;;  %v3571_v59 = vmul.f32 %v5460_v44, %v3551_v17  ;;  %v1472_v21 = vmin.f32 %v1449_v43, 6.0  ;;  %v3535_v52 = vadd.f32 %v5905_v55, %v3512_v0  ;;  %v6481_v17 = vld [vmem:[#allocation9_spill] sm:$0xff] }
 0x17c   : > { %v3339_v39 = vrot.slane %v3325_v28, %v4960_v26  ;;  %v1473_v27 = vmin.f32 %v1450_v53, 6.0  ;;  %v3536_v3 = vadd.f32 %v5905_v55, %v3513_v42  ;;  %3485 = vst [vmem:[#allocation2 + $0xc8] sm:$0xff] %v3381_v45  ;;  %v6477_v38 = vrot.slane %v5389_v47, %v5230_v50  ;;  %v3708_v45 = vld [vmem:[#allocation2 + $0x19] sm:$0xff] }
 0x17d   : > { %v1879_v54 = vcombine.high %v1878_v10, %v1878_v10  ;;  %v3572_v12 = vmul.f32 %v5460_v44, %v3552_v60  ;;  %v1838_v58 = vcombine.high %v1472_v21, %v1472_v21  ;;  %v1845_v5 = vrot.slane %v1472_v21, %v4960_v26 }
 0x17e   : > { %v5916_v62 = vcombine.low %v3332_v32, %v3339_v39  ;;  %v2928_v7 = vmul.f32 %v6477_v38, %v1878_v10  ;;  %v1855_v15 = vcombine.high %v1473_v27, %v1473_v27  ;;  %v1862_v30 = vrot.slane %v1473_v27, %v4960_v26  ;;  %v6487_v27 = vld [vmem:[#allocation15_spill] sm:$0xff] }
 0x17f   : > { %v6478_v24 = vrot.slane %v5440_v37, %v5221_v22  ;;  %v3587_v25 = vadd.f32 %v3571_v59, %v3535_v52  ;;  %v3588_v11 = vadd.f32 %v3572_v12, %v3536_v3  ;;  %v3623_v8 = vmul.f32 %v5463_v36, %v3603_v4  ;;  %v6488_v52 = vld [vmem:[#allocation11_spill] sm:$0xff]  ;;  %v3709_v4 = vld [vmem:[#allocation2 + $0x21] sm:$0xff] }
 0x180   : > { %3482 = vst [vmem:[#allocation2 + $0xb0] sm:$0xff] %v5916_v62  ;;  %v1852_v40 = vrot.slane %v1838_v58, %v4960_v26  ;;  %v1853_v41 = vcombine.high %v1845_v5, %v1845_v5  ;;  %v6480_v35 = vrot.slane %v6479_v6, %v5221_v22  ;;  %v1869_v9 = vrot.slane %v1855_v15, %v4960_v26  ;;  %v3760_v15 = vld [vmem:[#allocation2 + $0x1a] sm:$0xff] }
 0x181   : > { %v2929_v57 = vmul.f32 %v6478_v24, %v1879_v54  ;;  %v1870_v51 = vcombine.high %v1862_v30, %v1862_v30  ;;  %v6482_v14 = vrot.slane %v6481_v17, %v5230_v50  ;;  %v3624_v28 = vmul.f32 %v5463_v36, %v3604_v33  ;;  %v6491_v33 = vld [vmem:[#allocation13_spill] sm:$0xff] }
 0x182   : > { %v2920_v29 = vmul.f32 %v6480_v35, %v1845_v5  ;;  %v3639_v32 = vadd.f32 %v3623_v8, %v3587_v25  ;;  %v1854_v13 = vcombine.high %v1852_v40, %v1852_v40  ;;  %v6483_v43 = vrot.slane %v6481_v17, %v5221_v22  ;;  %v6492_v25 = vld [vmem:[#allocation7_spill] sm:$0xff]  ;;  %v6494_v8 = vld [vmem:[#allocation8_spill] sm:$0xff] }
 0x183   : > { %4403 = vst.sshfl [vmem:[#allocation2 + $0xe8] sm:$0x3 pattern:$0x76325410] %v2929_v57  ;;  %v2924_v37 = vmul.f32 %v6482_v14, %v1862_v30  ;;  %v6484_v0 = vrot.slane %v6481_v17, %v5224_v48  ;;  %v1871_v60 = vcombine.high %v1869_v9, %v1869_v9  ;;  %v6485_v39 = vrot.slane %v5389_v47, %v5221_v22  ;;  %v3761_v57 = vld [vmem:[#allocation2 + $0x22] sm:$0xff]  ;;  %v3865_v14 = vld [vmem:[#allocation2 + $0x31] sm:$0xff] }
 0x184   : > { %v2921_v53 = vmul.f32 %v6483_v43, %v1853_v41  ;;  %4402 = vst.sshfl [vmem:[#allocation2 + $0xd0] sm:$0x3 pattern:$0x76325410] %v2920_v29  ;;  %v6486_v10 = vrot.slane %v5389_v47, %v5224_v48  ;;  %v3640_v21 = vadd.f32 %v3624_v28, %v3588_v11  ;;  %v3676_v3 = vmul.f32 %v6488_v52, %v6487_v27 }
 0x185   : > { %v2922_v42 = vmul.f32 %v6484_v0, %v1852_v40  ;;  %v2925_v50 = vmul.f32 %v6485_v39, %v1870_v51  ;;  %v6489_v38 = vrot.slane %v6481_v17, %v5227_v49  ;;  %v6490_v58 = vrot.slane %v5389_v47, %v5227_v49  ;;  %v6495_v51 = vld [vmem:[#allocation14_spill] sm:$0xff]  ;;  %v6496_v0 = vld [vmem:[#allocation12_spill] sm:$0xff] }
 0x186   : > { %v2926_v59 = vmul.f32 %v6486_v10, %v1869_v9  ;;  %v3677_v22 = vmul.f32 %v6488_v52, %v5611_v61  ;;  %v3692_v30 = vadd.f32 %v3676_v3, %v3639_v32  ;;  %v3728_v24 = vmul.f32 %v6491_v33, %v3708_v45  ;;  %v3917_v39 = vld [vmem:[#allocation2 + $0x32] sm:$0xff] }
 0x187   : > { %v3389_v54 = vcombine.low %v2921_v53, %v2922_v42  ;;  %v2923_v12 = vmul.f32 %v6489_v38, %v1854_v13  ;;  %v2927_v5 = vmul.f32 %v6490_v58, %v1871_v60  ;;  %v6493_v11 = vsub.s32 7, %v6492_v25 }
 0x188   : > { %v3406_v48 = vcombine.low %v2925_v50, %v2926_v59  ;;  %v3693_v35 = vadd.f32 %v3677_v22, %v3640_v21  ;;  %v3729_v49 = vmul.f32 %v6491_v33, %v3709_v4  ;;  %v3744_v9 = vadd.f32 %v3728_v24, %v3692_v30  ;;  %v3918_v21 = vld [vmem:[#allocation2 + $0x3a] sm:$0xff] }
 0x189   : > { %v5964_v40 = vrot.slane %v6494_v8, %v6493_v11  ;;  %v3390_v41 = vcombine.low %v2923_v12, %v2924_v37  ;;  %v3407_v6 = vcombine.low %v2927_v5, %v2928_v7  ;;  %v3397_v47 = vrot.slane %v3389_v54, %v4960_v26  ;;  %v3866_v37 = vld [vmem:[#allocation2 + $0x39] sm:$0xff]  ;;  %v5976_v7 = vld [vmem:[%s6370_s4 + $0x8] ss:$0 sm:$0xff] }
 0x18a   : > { %v3414_v29 = vrot.slane %v3406_v48, %v4960_v26  ;;  %v3780_v17 = vmul.f32 %v6495_v51, %v3760_v15  ;;  %v3745_v13 = vadd.f32 %v3729_v49, %v3693_v35  ;;  %v3781_v43 = vmul.f32 %v6495_v51, %v3761_v57  ;;  %v6006_v49 = vld [vmem:[#allocation2 + $0x49] sm:$0xff] }
 0x18b   : > { %v3404_v28 = vrot.slane %v3390_v41, %v4960_v26  ;;  %v3421_v32 = vrot.slane %v3407_v6, %v4960_v26  ;;  %v3833_v42 = vmul.f32 %v6496_v0, %v5664_v20  ;;  %v3834_v60 = vmul.f32 %v6496_v0, %v5670_v19 }
 0x18c   : > { %v3796_v53 = vadd.f32 %v3780_v17, %v3744_v9  ;;  %v3797_v10 = vadd.f32 %v3781_v43, %v3745_v13  ;;  %v3885_v59 = vmul.f32 %v5964_v40, %v3865_v14  ;;  %v3886_v54 = vmul.f32 %v5964_v40, %v3866_v37  ;;  %v3868_v17 = vld [vmem:[#allocation2 + $0x51] sm:$0xff] }
 0x18d   : > { %v5982_v50 = vcombine.low %v3397_v47, %v3404_v28  ;;  %v5984_v26 = vcombine.low %v3414_v29, %v3421_v32  ;;  %v3514_v38 = vmul.f32 %v5369_v16, %v6487_v27  ;;  %v3515_v12 = vmul.f32 %v5369_v16, %v5611_v61 }
 0x18e   : > { %v3849_v3 = vadd.f32 %v3833_v42, %v3796_v53  ;;  %v3850_v58 = vadd.f32 %v3834_v60, %v3797_v10  ;;  %v3937_v5 = vmul.f32 %v5976_v7, %v3917_v39  ;;  %v3573_v22 = vmul.f32 %v3708_v45, %v5460_v44  ;;  %v3919_v10 = vld [vmem:[#allocation2 + $0x4a] sm:$0xff] }
 0x18f   : > { %3487 = vst [vmem:[#allocation2 + $0xd8] sm:$0xff] %v5982_v50  ;;  %3488 = vst [vmem:[#allocation2 + $0xe0] sm:$0xff] %v5984_v26  ;;  %v3574_v48 = vmul.f32 %v3709_v4, %v5460_v44  ;;  %v3938_v24 = vmul.f32 %v5976_v7, %v3918_v21  ;;  %v3537_v25 = vadd.f32 %v5905_v55, %v3514_v38 }
 0x190   : > { %v3901_v30 = vadd.f32 %v3885_v59, %v3849_v3  ;;  %v3538_v27 = vadd.f32 %v5905_v55, %v3515_v12  ;;  %v3902_v11 = vadd.f32 %v3886_v54, %v3850_v58  ;;  %v3625_v61 = vmul.f32 %v3760_v15, %v5463_v36  ;;  %v3920_v12 = vld [vmem:[#allocation2 + $0x52] sm:$0xff] }
 0x191   : > { %v3626_v8 = vmul.f32 %v3761_v57, %v5463_v36  ;;  %v3678_v41 = vmul.f32 %v6488_v52, %v5664_v20  ;;  %v3589_v35 = vadd.f32 %v3573_v22, %v3537_v25  ;;  %v3679_v4 = vmul.f32 %v6488_v52, %v5670_v19 }
 0x192   : > { %v3953_v6 = vadd.f32 %v3937_v5, %v3901_v30  ;;  %v3590_v45 = vadd.f32 %v3574_v48, %v3538_v27  ;;  %v3954_v47 = vadd.f32 %v3938_v24, %v3902_v11  ;;  %v3730_v29 = vmul.f32 %v3865_v14, %v6491_v33 }
 0x193   : > { %v3731_v9 = vmul.f32 %v3866_v37, %v6491_v33  ;;  %v3782_v15 = vmul.f32 %v3917_v39, %v6495_v51  ;;  %v3641_v28 = vadd.f32 %v3625_v61, %v3589_v35  ;;  %v3783_v13 = vmul.f32 %v3918_v21, %v6495_v51 }
 0x194   : > { %v3969_v57 = vmax.f32 %v3953_v6, 0.0  ;;  %v3642_v32 = vadd.f32 %v3626_v8, %v3590_v45  ;;  %v3970_v43 = vmax.f32 %v3954_v47, 0.0  ;;  %v3835_v53 = vmul.f32 %v6496_v0, %v5640_v31 }
 0x195   : > { %v3836_v42 = vmul.f32 %v6496_v0, %v5713_v1  ;;  %v3887_v60 = vmul.f32 %v5964_v40, %v6006_v49  ;;  %v3694_v3 = vadd.f32 %v3678_v41, %v3641_v28  ;;  %v3888_v38 = vmul.f32 %v5964_v40, %v3868_v17 }
 0x196   : > { %v3985_v59 = vmin.f32 %v3969_v57, 6.0  ;;  %v3695_v54 = vadd.f32 %v3679_v4, %v3642_v32  ;;  %v3986_v58 = vmin.f32 %v3970_v43, 6.0  ;;  %v3516_v5 = vmul.f32 %v5369_v16, %v5664_v20  ;;  %v6038_v57 = vld [vmem:[#allocation2 + $0x61] sm:$0xff] }
 0x197   : > { %v3517_v22 = vmul.f32 %v5369_v16, %v5670_v19  ;;  %v3575_v48 = vmul.f32 %v3865_v14, %v5460_v44  ;;  %v3746_v30 = vadd.f32 %v3730_v29, %v3694_v3  ;;  %v3939_v25 = vmul.f32 %v5976_v7, %v3919_v10 }
 0x198   : > { %v3747_v24 = vadd.f32 %v3731_v9, %v3695_v54  ;;  %v3576_v27 = vmul.f32 %v3866_v37, %v5460_v44  ;;  %v4001_v11 = vpack.c.bf16 %v3986_v58, %v3985_v59  ;;  %v3940_v61 = vmul.f32 %v5976_v7, %v3920_v12 }
 0x199   : > { %v3539_v8 = vadd.f32 %v5905_v55, %v3516_v5  ;;  %v3540_v41 = vadd.f32 %v5905_v55, %v3517_v22  ;;  %v3798_v6 = vadd.f32 %v3782_v15, %v3746_v30  ;;  %v3627_v35 = vmul.f32 %v3917_v39, %v5463_v36  ;;  %v6040_v39 = vld [vmem:[#allocation2 + $0x69] sm:$0xff] }
 0x19a   : > { %v3799_v20 = vadd.f32 %v3783_v13, %v3747_v24  ;;  %v3628_v19 = vmul.f32 %v3918_v21, %v5463_v36  ;;  %4515 = vmatprep.mubr.bf16.mxu1 %v4001_v11  ;;  %v3680_v4 = vmul.f32 %v6488_v52, %v5640_v31  ;;  %v3681_v37 = vmul.f32 %v6488_v52, %v5713_v1  ;;  %v3498_v13 = vld [vmem:[#allocation2 + $0x48] sm:$0xff] }
 0x19b   : > { %v3591_v14 = vadd.f32 %v3575_v48, %v3539_v8  ;;  %v3592_v45 = vadd.f32 %v3576_v27, %v3540_v41  ;;  %v3851_v47 = vadd.f32 %v3835_v53, %v3798_v6  ;;  %v3732_v9 = vmul.f32 %v6006_v49, %v6491_v33  ;;  %v3921_v41 = vld [vmem:[#allocation2 + $0x62] sm:$0xff] }
 0x19c   : > { %v3852_v29 = vadd.f32 %v3836_v42, %v3799_v20  ;;  %v3733_v15 = vmul.f32 %v3868_v17, %v6491_v33  ;;  %v3784_v32 = vmul.f32 %v3919_v10, %v6495_v51  ;;  %v3785_v31 = vmul.f32 %v3920_v12, %v6495_v51 }
 0x19d   : > { %v3643_v21 = vadd.f32 %v3627_v35, %v3591_v14  ;;  %v3644_v28 = vadd.f32 %v3628_v19, %v3592_v45  ;;  %v3903_v43 = vadd.f32 %v3887_v60, %v3851_v47  ;;  %v3837_v53 = vmul.f32 %v6496_v0, %v5767_v2  ;;  %v3663_v19 = vld [vmem:[#allocation2 + $0x68] sm:$0xff] }
 0x19e   : > { %v3904_v59 = vadd.f32 %v3888_v38, %v3852_v29  ;;  %v3838_v42 = vmul.f32 %v6496_v0, %v5705_v63  ;;  %v3889_v58 = vmul.f32 %v5964_v40, %v6038_v57  ;;  %v3890_v5 = vmul.f32 %v5964_v40, %v6040_v39 }
 0x19f   : > { %v3696_v3 = vadd.f32 %v3680_v4, %v3643_v21  ;;  %v3697_v54 = vadd.f32 %v3681_v37, %v3644_v28  ;;  %v3955_v22 = vadd.f32 %v3939_v25, %v3903_v43  ;;  %v3518_v30 = vmul.f32 %v5369_v16, %v3498_v13  ;;  %v3922_v4 = vld [vmem:[#allocation2 + $0x6a] sm:$0xff]  ;;  %v6069_v43 = vld [vmem:[#allocation2 + $0x79] sm:$0xff] }
 0x1a0   : > { %v3956_v48 = vadd.f32 %v3940_v61, %v3904_v59  ;;  %v3519_v60 = vmul.f32 %v5369_v16, %v5713_v1  ;;  %v3577_v63 = vmul.f32 %v6006_v49, %v5460_v44  ;;  %v3578_v27 = vmul.f32 %v3868_v17, %v5460_v44 }
 0x1a1   : > { %v3748_v38 = vadd.f32 %v3732_v9, %v3696_v3  ;;  %v3749_v24 = vadd.f32 %v3733_v15, %v3697_v54  ;;  %v3971_v11 = vmax.f32 %v3955_v22, 0.0  ;;  %v3541_v6 = vadd.f32 %v5905_v55, %v3518_v30  ;;  %v6074_v54 = vld [vmem:[#allocation2 + $0x81] sm:$0xff] }
 0x1a2   : > { %v3972_v8 = vmax.f32 %v3956_v48, 0.0  ;;  %v3542_v25 = vadd.f32 %v5905_v55, %v3519_v60  ;;  %v3629_v35 = vmul.f32 %v3919_v10, %v5463_v36  ;;  %v3630_v1 = vmul.f32 %v3920_v12, %v5463_v36 }
 0x1a3   : > { %v3800_v61 = vadd.f32 %v3784_v32, %v3748_v38  ;;  %v3801_v20 = vadd.f32 %v3785_v31, %v3749_v24  ;;  %v3987_v14 = vmin.f32 %v3971_v11, 6.0  ;;  %v3593_v49 = vadd.f32 %v3577_v63, %v3541_v6  ;;  %v6083_v63 = vld [vmem:[#allocation2 + $0x7a] sm:$0xff] }
 0x1a4   : > { %v3988_v45 = vmin.f32 %v3972_v8, 6.0  ;;  %v3594_v37 = vadd.f32 %v3578_v27, %v3542_v25  ;;  %v3941_v29 = vmul.f32 %v5976_v7, %v3921_v41  ;;  %v3682_v9 = vmul.f32 %v6488_v52, %v5767_v2 }
 0x1a5   : > { %v3853_v17 = vadd.f32 %v3837_v53, %v3800_v61  ;;  %v3854_v47 = vadd.f32 %v3838_v42, %v3801_v20  ;;  %v3645_v21 = vadd.f32 %v3629_v35, %v3593_v49  ;;  %v3683_v10 = vmul.f32 %v6488_v52, %v3663_v19  ;;  %v6089_v20 = vld [vmem:[#allocation2 + $0x82] sm:$0xff] }
 0x1a6   : > { %v4002_v15 = vpack.c.bf16 %v3988_v45, %v3987_v14  ;;  %v3646_v28 = vadd.f32 %v3630_v1, %v3594_v37  ;;  %v3942_v31 = vmul.f32 %v5976_v7, %v3922_v4  ;;  %v3734_v13 = vmul.f32 %v6038_v57, %v6491_v33 }
 0x1a7   : > { %v3905_v32 = vadd.f32 %v3889_v58, %v3853_v17  ;;  %v3906_v12 = vadd.f32 %v3890_v5, %v3854_v47  ;;  %v3698_v59 = vadd.f32 %v3682_v9, %v3645_v21  ;;  %v3735_v42 = vmul.f32 %v6040_v39, %v6491_v33 }
 0x1a8   : > { %4516 = vmatmul.mubr.bf16.vlgmr.msra.gmra.mrb[0].mxu1 %v4002_v15  ;;  %v3699_v53 = vadd.f32 %v3683_v10, %v3646_v28  ;;  %v3786_v3 = vmul.f32 %v3921_v41, %v6495_v51  ;;  %v3787_v5 = vmul.f32 %v3922_v4, %v6495_v51  ;;  %v3839_v48 = vmul.f32 %v6496_v0, %v5781_v23 }
 0x1a9   : > { %v3957_v22 = vadd.f32 %v3941_v29, %v3905_v32  ;;  %v3958_v58 = vadd.f32 %v3942_v31, %v3906_v12  ;;  %v3750_v30 = vadd.f32 %v3734_v13, %v3698_v59  ;;  %v3840_v38 = vmul.f32 %v6496_v0, %v5826_v46 }
 0x1aa   : > { %v3751_v60 = vadd.f32 %v3735_v42, %v3699_v53  ;;  %v3891_v24 = vmul.f32 %v5964_v40, %v6069_v43  ;;  %v3892_v8 = vmul.f32 %v5964_v40, %v6074_v54  ;;  %v3520_v6 = vmul.f32 %v5369_v16, %v5767_v2 }
 0x1ab   : > { %v3973_v27 = vmax.f32 %v3957_v22, 0.0  ;;  %v3974_v11 = vmax.f32 %v3958_v58, 0.0  ;;  %v3802_v25 = vadd.f32 %v3786_v3, %v3750_v30  ;;  %v3521_v35 = vmul.f32 %v3663_v19, %v5369_v16  ;;  %v6112_v3 = vld [vmem:[#allocation2 + $0x91] sm:$0xff] }
 0x1ac   : > { %v3803_v61 = vadd.f32 %v3787_v5, %v3751_v60  ;;  %v3579_v1 = vmul.f32 %v6038_v57, %v5460_v44  ;;  %v3943_v49 = vmul.f32 %v5976_v7, %v6083_v63  ;;  %v3543_v37 = vadd.f32 %v5905_v55, %v3520_v6 }
 0x1ad   : > { %v3989_v14 = vmin.f32 %v3973_v27, 6.0  ;;  %v3990_v45 = vmin.f32 %v3974_v11, 6.0  ;;  %v3855_v17 = vadd.f32 %v3839_v48, %v3802_v25  ;;  %v3544_v2 = vadd.f32 %v5905_v55, %v3521_v35  ;;  %v6122_v27 = vld [vmem:[#allocation2 + $0x99] sm:$0xff] }
 0x1ae   : > { %v3856_v47 = vadd.f32 %v3840_v38, %v3803_v61  ;;  %v3580_v29 = vmul.f32 %v6040_v39, %v5460_v44  ;;  %v3944_v19 = vmul.f32 %v5976_v7, %v6089_v20  ;;  %v3595_v15 = vadd.f32 %v3579_v1, %v3543_v37  ;;  %v3925_v35 = vld [vmem:[#allocation2 + $0x92] sm:$0xff] }
 0x1af   : > { %v4003_v9 = vpack.c.bf16 %v3990_v45, %v3989_v14  ;;  %v3631_v57 = vmul.f32 %v3921_v41, %v5463_v36  ;;  %v3907_v21 = vadd.f32 %v3891_v24, %v3855_v17  ;;  %v3632_v32 = vmul.f32 %v3922_v4, %v5463_v36  ;;  %v3502_v4 = vld [vmem:[#allocation2 + $0x78] sm:$0xff] }
 0x1b0   : > { %v3908_v28 = vadd.f32 %v3892_v8, %v3856_v47  ;;  %v3596_v10 = vadd.f32 %v3580_v29, %v3544_v2  ;;  %v3684_v31 = vmul.f32 %v6488_v52, %v5781_v23  ;;  %v3685_v39 = vmul.f32 %v6488_v52, %v5826_v46  ;;  %v6129_v45 = vld [vmem:[#allocation2 + $0x9a] sm:$0xff] }
 0x1b1   : > { %4519 = vmatprep.mubr.bf16.mxu1 %v4003_v9  ;;  %v3647_v12 = vadd.f32 %v3631_v57, %v3595_v15  ;;  %v3736_v13 = vmul.f32 %v6069_v43, %v6491_v33  ;;  %v3959_v59 = vadd.f32 %v3943_v49, %v3907_v21  ;;  %v3737_v41 = vmul.f32 %v6074_v54, %v6491_v33  ;;  %v3667_v9 = vld [vmem:[#allocation2 + $0x98] sm:$0xff] }
 0x1b2   : > { %v3960_v53 = vadd.f32 %v3944_v19, %v3908_v28  ;;  %v3648_v42 = vadd.f32 %v3632_v32, %v3596_v10  ;;  %v3788_v58 = vmul.f32 %v6083_v63, %v6495_v51  ;;  %v3789_v23 = vmul.f32 %v6089_v20, %v6495_v51 }
 0x1b3   : > { %v3700_v22 = vadd.f32 %v3684_v31, %v3647_v12  ;;  %v3975_v5 = vmax.f32 %v3959_v59, 0.0  ;;  %v3841_v60 = vmul.f32 %v6496_v0, %v5844_v18  ;;  %v3842_v24 = vmul.f32 %v6496_v0, %v5813_v56 }
 0x1b4   : > { %v3976_v48 = vmax.f32 %v3960_v53, 0.0  ;;  %v3701_v30 = vadd.f32 %v3685_v39, %v3648_v42  ;;  %v3893_v11 = vmul.f32 %v5964_v40, %v6112_v3  ;;  %v3522_v8 = vmul.f32 %v5369_v16, %v3502_v4  ;;  %v6153_v53 = vld [vmem:[#allocation2 + $0xa9] sm:$0xff] }
 0x1b5   : > { %v3752_v38 = vadd.f32 %v3736_v13, %v3700_v22  ;;  %v3991_v6 = vmin.f32 %v3975_v5, 6.0  ;;  %v3523_v1 = vmul.f32 %v5369_v16, %v5826_v46  ;;  %v3581_v56 = vmul.f32 %v6069_v43, %v5460_v44  ;;  %v3504_v42 = vld [vmem:[#allocation2 + $0x90] sm:$0xff] }
 0x1b6   : > { %v3992_v25 = vmin.f32 %v3976_v48, 6.0  ;;  %v3753_v61 = vadd.f32 %v3737_v41, %v3701_v30  ;;  %v3545_v49 = vadd.f32 %v5905_v55, %v3522_v8  ;;  %v3582_v37 = vmul.f32 %v6074_v54, %v5460_v44  ;;  %v6158_v22 = vld [vmem:[#allocation2 + $0xb1] sm:$0xff] }
 0x1b7   : > { %v3804_v14 = vadd.f32 %v3788_v58, %v3752_v38  ;;  %v3894_v2 = vmul.f32 %v5964_v40, %v6122_v27  ;;  %v3546_v29 = vadd.f32 %v5905_v55, %v3523_v1  ;;  %v3945_v19 = vmul.f32 %v5976_v7, %v3925_v35 }
 0x1b8   : > { %v4004_v17 = vpack.c.bf16 %v3992_v25, %v3991_v6  ;;  %v3805_v47 = vadd.f32 %v3789_v23, %v3753_v61  ;;  %v3597_v15 = vadd.f32 %v3581_v56, %v3545_v49  ;;  %v3633_v57 = vmul.f32 %v6083_v63, %v5463_v36  ;;  %v3927_v25 = vld [vmem:[#allocation2 + $0xaa] sm:$0xff] }
 0x1b9   : > { %v3857_v46 = vadd.f32 %v3841_v60, %v3804_v14  ;;  %v3946_v54 = vmul.f32 %v5976_v7, %v6129_v45  ;;  %v3598_v21 = vadd.f32 %v3582_v37, %v3546_v29  ;;  %v3634_v28 = vmul.f32 %v6089_v20, %v5463_v36  ;;  %v3668_v29 = vld [vmem:[#allocation2 + $0xa8] sm:$0xff] }
 0x1ba   : > { %4520 = vmatmul.mubr.bf16.gmra.mrb[4].mxu1 %v4004_v17  ;;  %v3858_v43 = vadd.f32 %v3842_v24, %v3805_v47  ;;  %v3649_v32 = vadd.f32 %v3633_v57, %v3597_v15  ;;  %v3686_v12 = vmul.f32 %v6488_v52, %v5844_v18  ;;  %v3687_v31 = vmul.f32 %v6488_v52, %v3667_v9  ;;  %v3928_v17 = vld [vmem:[#allocation2 + $0xb2] sm:$0xff] }
 0x1bb   : > { %v3909_v10 = vadd.f32 %v3893_v11, %v3857_v46  ;;  %v3650_v13 = vadd.f32 %v3634_v28, %v3598_v21  ;;  %v3738_v63 = vmul.f32 %v6112_v3, %v6491_v33  ;;  %v3739_v59 = vmul.f32 %v6122_v27, %v6491_v33 }
 0x1bc   : > { %v3910_v39 = vadd.f32 %v3894_v2, %v3858_v43  ;;  %v3702_v20 = vadd.f32 %v3686_v12, %v3649_v32  ;;  %v3790_v4 = vmul.f32 %v3925_v35, %v6495_v51  ;;  %v3791_v18 = vmul.f32 %v6129_v45, %v6495_v51 }
 0x1bd   : > { %v3961_v41 = vadd.f32 %v3945_v19, %v3909_v10  ;;  %v3703_v23 = vadd.f32 %v3687_v31, %v3650_v13  ;;  %v3843_v5 = vmul.f32 %v6496_v0, %v5873_v34  ;;  %v3844_v48 = vmul.f32 %v6496_v0, %v5916_v62  ;;  %v3826_v13 = vld [vmem:[#allocation2 + $0xc8] sm:$0xff] }
 0x1be   : > { %v3962_v58 = vadd.f32 %v3946_v54, %v3910_v39  ;;  %v3754_v60 = vadd.f32 %v3738_v63, %v3702_v20  ;;  %v3895_v38 = vmul.f32 %v5964_v40, %v6153_v53  ;;  %v3524_v24 = vmul.f32 %v5369_v16, %v3504_v42  ;;  %v3877_v63 = vld [vmem:[#allocation2 + $0xc1] sm:$0xff]  ;;  %v3507_v20 = vld [vmem:[#allocation2 + $0xb0] sm:$0xff] }
 0x1bf   : > { %v3977_v30 = vmax.f32 %v3961_v41, 0.0  ;;  %v3755_v8 = vadd.f32 %v3739_v59, %v3703_v23  ;;  %v3896_v6 = vmul.f32 %v5964_v40, %v6158_v22  ;;  %v3525_v61 = vmul.f32 %v3667_v9, %v5369_v16 }
 0x1c0   : > { %v3978_v11 = vmax.f32 %v3962_v58, 0.0  ;;  %v3806_v34 = vadd.f32 %v3790_v4, %v3754_v60  ;;  %v3547_v14 = vadd.f32 %v5905_v55, %v3524_v24  ;;  %v3583_v49 = vmul.f32 %v6112_v3, %v5460_v44  ;;  %v3878_v24 = vld [vmem:[#allocation2 + $0xc9] sm:$0xff] }
 0x1c1   : > { %v3993_v1 = vmin.f32 %v3977_v30, 6.0  ;;  %v3807_v37 = vadd.f32 %v3791_v18, %v3755_v8  ;;  %v3548_v47 = vadd.f32 %v5905_v55, %v3525_v61  ;;  %v3584_v2 = vmul.f32 %v6122_v27, %v5460_v44  ;;  %v3825_v27 = vld [vmem:[#allocation2 + $0xc0] sm:$0xff] }
 0x1c2   : > { %v3994_v56 = vmin.f32 %v3978_v11, 6.0  ;;  %v3859_v46 = vadd.f32 %v3843_v5, %v3806_v34  ;;  %v3947_v19 = vmul.f32 %v5976_v7, %v3927_v25  ;;  %v3599_v9 = vadd.f32 %v3583_v49, %v3547_v14 }
 0x1c3   : > { %v3635_v15 = vmul.f32 %v3925_v35, %v5463_v36  ;;  %v3860_v43 = vadd.f32 %v3844_v48, %v3807_v37  ;;  %v3600_v54 = vadd.f32 %v3584_v2, %v3548_v47  ;;  %v3636_v3 = vmul.f32 %v6129_v45, %v5463_v36  ;;  %v3930_v37 = vld [vmem:[#allocation2 + $0xca] sm:$0xff] }
 0x1c4   : > { %v4005_v57 = vpack.c.bf16 %v3994_v56, %v3993_v1  ;;  %v3911_v21 = vadd.f32 %v3895_v38, %v3859_v46  ;;  %v3948_v28 = vmul.f32 %v5976_v7, %v3928_v17  ;;  %v3688_v32 = vmul.f32 %v6488_v52, %v3668_v29  ;;  %v3929_v56 = vld [vmem:[#allocation2 + $0xc2] sm:$0xff] }
 0x1c5   : > { %v3651_v10 = vadd.f32 %v3635_v15, %v3599_v9  ;;  %v3912_v12 = vadd.f32 %v3896_v6, %v3860_v43  ;;  %v3652_v31 = vadd.f32 %v3636_v3, %v3600_v54  ;;  %v3689_v39 = vmul.f32 %v6488_v52, %v5916_v62 }
 0x1c6   : > { %4523 = vmatprep.mubr.bf16.mxu1 %v4005_v57  ;;  %v3741_v35 = vmul.f32 %v6158_v22, %v6491_v33  ;;  %v3963_v59 = vadd.f32 %v3947_v19, %v3911_v21  ;;  %v3740_v42 = vmul.f32 %v6153_v53, %v6491_v33  ;;  %v3792_v41 = vmul.f32 %v3927_v25, %v6495_v51 }
 0x1c7   : > { %v3704_v45 = vadd.f32 %v3688_v32, %v3651_v10  ;;  %v3964_v4 = vadd.f32 %v3948_v28, %v3912_v12  ;;  %v3705_v18 = vadd.f32 %v3689_v39, %v3652_v31  ;;  %v3793_v58 = vmul.f32 %v3928_v17, %v6495_v51 }
 0x1c8   : > { %v3845_v23 = vmul.f32 %v6496_v0, %v3825_v27  ;;  %v3979_v62 = vmax.f32 %v3963_v59, 0.0  ;;  %v3846_v48 = vmul.f32 %v6496_v0, %v3826_v13  ;;  %v3897_v30 = vmul.f32 %v5964_v40, %v3877_v63 }
 0x1c9   : > { %v3756_v5 = vadd.f32 %v3740_v42, %v3704_v45  ;;  %v3980_v60 = vmax.f32 %v3964_v4, 0.0  ;;  %v3757_v38 = vadd.f32 %v3741_v35, %v3705_v18  ;;  %v3526_v11 = vmul.f32 %v3668_v29, %v5369_v16  ;;  %v3879_v42 = vld [vmem:[#allocation2 + $0xd9] sm:$0xff] }
 0x1ca   : > { %v3527_v8 = vmul.f32 %v5369_v16, %v3507_v20  ;;  %v3995_v6 = vmin.f32 %v3979_v62, 6.0  ;;  %v3585_v1 = vmul.f32 %v6153_v53, %v5460_v44  ;;  %v3586_v34 = vmul.f32 %v6158_v22, %v5460_v44 }
 0x1cb   : > { %v3808_v61 = vadd.f32 %v3792_v41, %v3756_v5  ;;  %v3996_v14 = vmin.f32 %v3980_v60, 6.0  ;;  %v3809_v49 = vadd.f32 %v3793_v58, %v3757_v38  ;;  %v3549_v47 = vadd.f32 %v5905_v55, %v3526_v11  ;;  %v3931_v58 = vld [vmem:[#allocation2 + $0xda] sm:$0xff] }
 0x1cc   : > { %v3550_v2 = vadd.f32 %v5905_v55, %v3527_v8  ;;  %v3898_v29 = vmul.f32 %v5964_v40, %v3878_v24  ;;  %v3637_v16 = vmul.f32 %v3927_v25, %v5463_v36  ;;  %v3638_v19 = vmul.f32 %v3928_v17, %v5463_v36 }
 0x1cd   : > { %v3861_v46 = vadd.f32 %v3845_v23, %v3808_v61  ;;  %v4006_v9 = vpack.c.bf16 %v3996_v14, %v3995_v6  ;;  %v3862_v53 = vadd.f32 %v3846_v48, %v3809_v49  ;;  %v3601_v15 = vadd.f32 %v3585_v1, %v3549_v47  ;;  %v3932_v23 = vld [vmem:[#allocation2 + $0xe2] sm:$0xff]  ;;  %v4652_v49 = vld [vmem:[%s4919_s26 + $0x18] sm:$0xff]  ;;  %v6228_v47 = vld [vmem:[%s6373_s7] ss:$0 sm:$0xff] }
 0x1ce   : > { %v3602_v57 = vadd.f32 %v3586_v34, %v3550_v2  ;;  %v3949_v22 = vmul.f32 %v5976_v7, %v3929_v56  ;;  %v3950_v43 = vmul.f32 %v5976_v7, %v3930_v37  ;;  %v3690_v54 = vmul.f32 %v3825_v27, %v6488_v52  ;;  %v4651_v34 = vld [vmem:[%s4919_s26 + $0x38] sm:$0xff]  ;;  %v4654_v2 = vld [vmem:[%s4919_s26 + $0x40] sm:$0x3] }
 0x1cf   : > { %v3913_v44 = vadd.f32 %v3897_v30, %v3861_v46  ;;  %4524 = vmatmul.mubr.bf16.gmra.mrb[8].mxu1 %v4006_v9  ;;  %v3914_v55 = vadd.f32 %v3898_v29, %v3862_v53  ;;  %v3653_v3 = vadd.f32 %v3637_v16, %v3601_v15  ;;  %v3691_v28 = vmul.f32 %v3826_v13, %v6488_v52  ;;  %v3880_v13 = vld [vmem:[#allocation2 + $0xe1] sm:$0xff] }
 0x1d0   : > { %v3654_v21 = vadd.f32 %v3638_v19, %v3602_v57  ;;  %v3742_v36 = vmul.f32 %v3877_v63, %v6491_v33  ;;  %v3743_v12 = vmul.f32 %v3878_v24, %v6491_v33  ;;  %v3794_v39 = vmul.f32 %v3929_v56, %v6495_v51  ;;  %v4653_v56 = vld [vmem:[%s4919_s26 + $0x20] sm:$0xff]  ;;  %v4655_v29 = vld [vmem:[%s4919_s26 + $0x28] sm:$0x3] }
 0x1d1   : > { %v3965_v25 = vadd.f32 %v3949_v22, %v3913_v44  ;;  %v3966_v17 = vadd.f32 %v3950_v43, %v3914_v55  ;;  %v3706_v10 = vadd.f32 %v3690_v54, %v3653_v3  ;;  %v3795_v45 = vmul.f32 %v3930_v37, %v6495_v51 }
 0x1d2   : > { %v3707_v32 = vadd.f32 %v3691_v28, %v3654_v21  ;;  %v3847_v52 = vmul.f32 %v6496_v0, %v5982_v50  ;;  %v3848_v33 = vmul.f32 %v6496_v0, %v5984_v26  ;;  %v3899_v18 = vmul.f32 %v5964_v40, %v3879_v42 }
 0x1d3   : > { %v3981_v31 = vmax.f32 %v3965_v25, 0.0  ;;  %v3982_v35 = vmax.f32 %v3966_v17, 0.0  ;;  %v3758_v59 = vadd.f32 %v3742_v36, %v3706_v10  ;;  %v3900_v48 = vmul.f32 %v5964_v40, %v3880_v13  ;;  %v4650_v40 = vld [vmem:[%s4919_s26 + $0x30] sm:$0xff]  ;;  %v4656_v10 = vld [vmem:[%s4919_s26 + $0x60] sm:$0xff] }
 0x1d4   : > { %v3759_v27 = vadd.f32 %v3743_v12, %v3707_v32  ;;  %v3951_v60 = vmul.f32 %v5976_v7, %v3931_v58  ;;  %v3952_v0 = vmul.f32 %v5976_v7, %v3932_v23  ;;  %v4183_v1 = vrot.slane %v4650_v40, 1  ;;  %v4657_v12 = vld [vmem:[%s4919_s26 + $0x68] sm:$0xff] }
 0x1d5   : > { %v3997_v41 = vmin.f32 %v3981_v31, 6.0  ;;  %v3998_v63 = vmin.f32 %v3982_v35, 6.0  ;;  %v3810_v20 = vadd.f32 %v3794_v39, %v3758_v59  ;;  %v4184_v14 = vrot.slane %v4651_v34, 1  ;;  %v4658_v39 = vld [vmem:[%s4919_s26 + $0x48] sm:$0xff]  ;;  %v4659_v59 = vld [vmem:[%s4919_s26 + $0x50] sm:$0xff] }
 0x1d6   : > { %v3811_v4 = vadd.f32 %v3795_v45, %v3759_v27  ;;  %v4178_v7 = vrot.slane %v4652_v49, 1  ;;  %v4179_v37 = vrot.slane %v4653_v56, 1  ;;  %v4186_v46 = vrot.slane %v4654_v2, 1  ;;  %v4660_v45 = vld [vmem:[%s4919_s26 + $0x70] sm:$0x3] }
 0x1d7   : > { %v4007_v62 = vpack.c.bf16 %v3998_v63, %v3997_v41  ;;  %v3863_v5 = vadd.f32 %v3847_v52, %v3810_v20  ;;  %v4181_v16 = vrot.slane %v4655_v29, 1  ;;  %v4185_v9 = vsel %vm4177_vm0, %v4183_v1, %v4184_v14  ;;  %v4661_v41 = vld [vmem:[%s4919_s26 + $0x58] sm:$0x3]  ;;  %v4666_v1 = vld [vmem:[%s4919_s26 + $0xa0] sm:$0x3] }
 0x1d8   : > { %v3864_v51 = vadd.f32 %v3848_v33, %v3811_v4  ;;  %v4180_v57 = vsel %vm4177_vm0, %v4178_v7, %v4179_v37  ;;  %v4187_v43 = vsel %vm4177_vm0, %v4184_v14, %v4186_v46  ;;  %v4193_v32 = vrot.slane %v4656_v10, 1  ;;  %v4667_v14 = vld [vmem:[%s4919_s26 + $0x88] sm:$0x3] }
 0x1d9   : > { %4527 = vmatprep.mubr.bf16.mxu1 %v4007_v62  ;;  %v3915_v50 = vadd.f32 %v3899_v18, %v3863_v5  ;;  %v4182_v21 = vsel %vm4177_vm0, %v4179_v37, %v4181_v16  ;;  %v4194_v31 = vrot.slane %v4657_v12, 1  ;;  %v4188_v35 = vrot.slane %v4658_v39, 1 }
 0x1da   : > { %v3916_v30 = vadd.f32 %v3900_v48, %v3864_v51  ;;  %v4189_v27 = vrot.slane %v4659_v59, 1  ;;  %v4196_v42 = vrot.slane %v4660_v45, 1  ;;  %v4191_v52 = vrot.slane %v4661_v41, 1 }
 0x1db   : > { %v3967_v26 = vadd.f32 %v3951_v60, %v3915_v50  ;;  %v4195_v63 = vsel %vm4177_vm0, %v4193_v32, %v4194_v31  ;;  %v4206_v34 = vrot.slane %v4666_v1, 1  ;;  %v4201_v49 = vrot.slane %v4667_v14, 1  ;;  %v4672_v32 = vld [vmem:[%s4919_s26 + $0xd0] sm:$0x3] }
 0x1dc   : > { %v3968_v38 = vadd.f32 %v3952_v0, %v3916_v30  ;;  %v4190_v33 = vsel %vm4177_vm0, %v4188_v35, %v4189_v27  ;;  %v4197_v23 = vsel %vm4177_vm0, %v4194_v31, %v4196_v42  ;;  %v4192_v48 = vsel %vm4177_vm0, %v4189_v27, %v4191_v52  ;;  %v4673_v31 = vld [vmem:[%s4919_s26 + $0xb8] sm:$0x3] }
 0x1dd   : > { %v3983_v24 = vmax.f32 %v3967_v26, 0.0  ;;  %v4662_v26 = vld [vmem:[%s4919_s26 + $0x90] sm:$0xff]  ;;  %v4216_v12 = vrot.slane %v4672_v32, 1  ;;  %v4211_v39 = vrot.slane %v4673_v31, 1 }
 0x1de   : > { %v3984_v11 = vmax.f32 %v3968_v38, 0.0  ;;  %v4203_v38 = vrot.slane %v4662_v26, 1 }
 0x1df   : > { %v3999_v8 = vmin.f32 %v3983_v24, 6.0  ;;  %v4663_v24 = vld [vmem:[%s4919_s26 + $0x98] sm:$0xff] }
 0x1e0   : > { %v4000_v6 = vmin.f32 %v3984_v11, 6.0  ;;  %v4204_v11 = vrot.slane %v4663_v24, 1 }
 0x1e2   : > { %v4008_v61 = vpack.c.bf16 %v4000_v6, %v3999_v8  ;;  %v4664_v8 = vld [vmem:[%s4919_s26 + $0x78] sm:$0xff]  ;;  %v4205_v56 = vsel %vm4177_vm0, %v4203_v38, %v4204_v11 }
 0x1e3   : > { %v4198_v6 = vrot.slane %v4664_v8, 1 }
 0x1e4   : > { %4528 = vmatmul.mubr.bf16.gmra.mrb[12].mxu1 %v4008_v61  ;;  %v4665_v61 = vld [vmem:[%s4919_s26 + $0x80] sm:$0xff] }
 0x1e5   : > { %v4199_v40 = vrot.slane %v4665_v61, 1 }
 0x1e7   : > { %v4200_v46 = vsel %vm4177_vm0, %v4198_v6, %v4199_v40 }
 0x27b   : > { %v4517_v19 = vpop.f32.mrb[0].mxu1 }
 0x27c   : > { %v4123_v53 = vadd.f32 %v4517_v19, %v6228_v47  ;;  %v4114_v15 = vpop.f32.mrb[1].mxu1  ;;  %v4207_v19 = vsel %vm4177_vm0, %v4204_v11, %v4206_v34 }
 0x27d   : > { %v4115_v44 = vadd.f32 %v6228_v47, %v4114_v15  ;;  %v4518_v22 = vpop.f32.mrb[2].mxu1 }
 0x27e   : > { %v4236_v54 = vadd.f32 %v4185_v9, %v4123_v53  ;;  %v4126_v55 = vadd.f32 %v4518_v22, %v6228_v47  ;;  %v4117_v3 = vpop.f32.mrb[3].mxu1 }
 0x27f   : > { %v4234_v28 = vadd.f32 %v4180_v57, %v4115_v44  ;;  %v4118_v25 = vadd.f32 %v6228_v47, %v4117_v3  ;;  %v4202_v57 = vsel %vm4177_vm0, %v4199_v40, %v4201_v49 }
 0x280   : > { %4252 = vst [vmem:[%s6242_s24 + $0x10] sm:$0xff] %v4236_v54  ;;  %v4237_v36 = vadd.f32 %v4187_v43, %v4126_v55  ;;  %v4668_v55 = vld [vmem:[%s4919_s26 + $0xc0] sm:$0xff] }
 0x281   : > { %4250 = vst [vmem:[%s6242_s24] sm:$0xff] %v4234_v28  ;;  %v4235_v17 = vadd.f32 %v4182_v21, %v4118_v25  ;;  %v4213_v3 = vrot.slane %v4668_v55, 1  ;;  %v4669_v21 = vld [vmem:[%s4919_s26 + $0xc8] sm:$0xff] }
 0x282   : > { %4253 = vst [vmem:[%s6242_s24 + $0x18] sm:$0xff] %v4237_v36  ;;  %v4214_v28 = vrot.slane %v4669_v21, 1  ;;  %v4670_v25 = vld [vmem:[%s4919_s26 + $0xa8] sm:$0xff] }
 0x283   : > { %4251 = vst [vmem:[%s6242_s24 + $0x8] sm:$0xff] %v4235_v17  ;;  %v4208_v36 = vrot.slane %v4670_v25, 1  ;;  %v4671_v17 = vld [vmem:[%s4919_s26 + $0xb0] sm:$0xff] }
 0x284   : > { %v4209_v10 = vrot.slane %v4671_v17, 1  ;;  %v4215_v59 = vsel %vm4177_vm0, %v4213_v3, %v4214_v28 }
 0x286   : > { %v4210_v42 = vsel %vm4177_vm0, %v4208_v36, %v4209_v10 }
 0x28d   : > { %v4521_v13 = vpop.f32.mrb[4].mxu1 }
 0x28e   : > { %v4139_v20 = vadd.f32 %v4521_v13, %v6228_v47  ;;  %v4130_v4 = vpop.f32.mrb[5].mxu1  ;;  %v4217_v13 = vsel %vm4177_vm0, %v4214_v28, %v4216_v12 }
 0x28f   : > { %v4131_v18 = vadd.f32 %v6228_v47, %v4130_v4  ;;  %v4522_v58 = vpop.f32.mrb[6].mxu1 }
 0x290   : > { %v4240_v62 = vadd.f32 %v4195_v63, %v4139_v20  ;;  %v4142_v5 = vadd.f32 %v4522_v58, %v6228_v47  ;;  %v4133_v51 = vpop.f32.mrb[7].mxu1 }
 0x291   : > { %v4238_v50 = vadd.f32 %v4190_v33, %v4131_v18  ;;  %v4134_v30 = vadd.f32 %v6228_v47, %v4133_v51  ;;  %v4212_v33 = vsel %vm4177_vm0, %v4209_v10, %v4211_v39 }
 0x292   : > { %4256 = vst [vmem:[%s6242_s24 + $0x30] sm:$0xff] %v4240_v62  ;;  %v4241_v60 = vadd.f32 %v4197_v23, %v4142_v5 }
 0x293   : > { %4254 = vst [vmem:[%s6242_s24 + $0x20] sm:$0xff] %v4238_v50  ;;  %v4239_v0 = vadd.f32 %v4192_v48, %v4134_v30 }
 0x294   : > { %4257 = vst [vmem:[%s6242_s24 + $0x38] sm:$0xff] %v4241_v60 }
 0x295   : > { %4255 = vst [vmem:[%s6242_s24 + $0x28] sm:$0xff] %v4239_v0 }
 0x2a2   : > { %v4525_v7 = vpop.f32.mrb[8].mxu1 }
 0x2a3   : > { %v4155_v37 = vadd.f32 %v4525_v7, %v6228_v47  ;;  %v4146_v2 = vpop.f32.mrb[9].mxu1 }
 0x2a4   : > { %v4147_v29 = vadd.f32 %v6228_v47, %v4146_v2  ;;  %v4526_v16 = vpop.f32.mrb[10].mxu1 }
 0x2a5   : > { %v4244_v9 = vadd.f32 %v4205_v56, %v4155_v37  ;;  %v4158_v53 = vadd.f32 %v4526_v16, %v6228_v47  ;;  %v4149_v15 = vpop.f32.mrb[11].mxu1 }
 0x2a6   : > { %v4242_v44 = vadd.f32 %v4200_v46, %v4147_v29  ;;  %v4150_v22 = vadd.f32 %v6228_v47, %v4149_v15 }
 0x2a7   : > { %4260 = vst [vmem:[%s6242_s24 + $0x50] sm:$0xff] %v4244_v9  ;;  %v4245_v43 = vadd.f32 %v4207_v19, %v4158_v53 }
 0x2a8   : > { %4258 = vst [vmem:[%s6242_s24 + $0x40] sm:$0xff] %v4242_v44  ;;  %v4243_v54 = vadd.f32 %v4202_v57, %v4150_v22 }
 0x2a9   : > { %4261 = vst [vmem:[%s6242_s24 + $0x58] sm:$0xff] %v4245_v43 }
 0x2aa   : > { %4259 = vst [vmem:[%s6242_s24 + $0x48] sm:$0xff] %v4243_v54 }
 0x2b7   : > { %v4529_v35 = vpop.f32.mrb[12].mxu1 }
 0x2b8   : > { %v4171_v27 = vadd.f32 %v4529_v35, %v6228_v47  ;;  %v4162_v45 = vpop.f32.mrb[13].mxu1 }
 0x2b9   : > { %v4163_v41 = vadd.f32 %v6228_v47, %v4162_v45  ;;  %v4530_v52 = vpop.f32.mrb[14].mxu1 }
 0x2ba   : > { %v4248_v63 = vadd.f32 %v4215_v59, %v4171_v27  ;;  %v4174_v20 = vadd.f32 %v4530_v52, %v6228_v47  ;;  %v4165_v4 = vpop.f32.mrb[15].mxu1 }
 0x2bb   : > { %v4246_v18 = vadd.f32 %v4210_v42, %v4163_v41  ;;  %v4166_v58 = vadd.f32 %v6228_v47, %v4165_v4 }
 0x2bc   : > { %4264 = vst [vmem:[%s6242_s24 + $0x70] sm:$0xff] %v4248_v63  ;;  %v4249_v23 = vadd.f32 %v4217_v13, %v4174_v20 }
 0x2bd   : > { %4262 = vst [vmem:[%s6242_s24 + $0x60] sm:$0xff] %v4246_v18  ;;  %v4247_v62 = vadd.f32 %v4212_v33, %v4166_v58 }
 0x2be   : > { %4265 = vst [vmem:[%s6242_s24 + $0x78] sm:$0xff] %v4249_v23 }
 0x2bf   : > { %4263 = vst [vmem:[%s6242_s24 + $0x68] sm:$0xff] %v4247_v62 }
 0x2c0   : > { %4695 = shalt.err (!%p4692_p7)
}
 0x2c1   : > { %s4696_s16 = scalar_lea.hbm %s6305_s17, 2048  ;;  %s4700_s26 = scalar_lea.hbm %s6374_s8, 8192 }
 0x2c2   : > { %p4697_p9 = scmp.ne.s32.totalorder %s6305_s17, %s4696_s16  ;;  %p4701_p12 = scmp.lt.u32.totalorder %s6305_s17, %s6374_s8 }
 0x2c3   : > { %p4702_p13 = scmp.lt.u32.totalorder %s4700_s26, %s4696_s16  ;;  %p4704_p1 = scmp.lt.u32.totalorder %s4696_s16, %s6305_s17 }
 0x2c4   : > { %p4698_p10 = pnand %p4697_p9, %p4883_p3 }
 0x2c5   : > { %p4703_p0 = por %p4702_p13, %p4701_p12 }
 0x2c6   : > { %p4699_p11 = pneg %p4698_p10 }
 0x2c7   : > { %p4705_p2 = por %p4704_p1, %p4703_p0 }
 0x2c9   : > { %p4706_p4 = pnand %p4705_p2, %p4699_p11 }
 0x2cb   : > { %4709 = shalt.err (!%p4706_p4)
}
 0x2cc   : > { %s4785_s22 = smov 128   ;;  %s4786_s13 = smov 8  }
 0x2cd   : > { %4533 = dma.vmem_to_hbm [thread:$0]  (%p4883_p3), %s6307_s9, 2048, %s6305_s17, %s6314_s21, %s4785_s22, %s4785_s22, %s4786_s13  }
 0x2ce PF: > { %p4539_p5 = scmp.ge.s32.totalorder %s4776_s12, 2  ;;  %s4298_s14 = sand.u32 1, %s4748_s27  }
 0x2cf   : > { %s4299_s16 = scalar_lea.sflag [#allocation4], %s4298_s14 }
 0x2d0   : > { %p4536_p6 = pnand %p4539_p5, %p4892_p8 }
 0x2d2   : > { %4743 = dma.done.wait (!%p4536_p6), %s4299_s16, 2048  }
 0x2d3   : > { %4745 = vsyncadd (!%p4536_p6), %s4299_s16, 4294965248  ;;  %s21_s12 = sadd.s32 1, %s4776_s12   ;;  %s6497_s18 = sld [smem:[#allocation6_spill]] }
 0x2d4   : > { %p18_p7 = scmp.ge.s32.totalorder %s21_s12, 6   ;;  %s6498_s27 = smov %s4752_s28 }
 0x2d5   : > { %s6499_s28 = smov %s4756_s29  ;;  %s6500_s29 = smov %s4901_s23 }
 0x2d6   : > { %s6501_s30 = smov %s4768_s10  ;;  %s6502_s9 = smov %s4772_s11 }
 0x2d7   : > { %s6503_s10 = smov %s6506_s15  ;;  %20 = sbr.rel (!%p18_p7) target bundleno = 5 (0x5), region = 93 }
 0x2d9   : > { %s6504_s11 = smov %s6497_s18 }
 0x2de   :  { %4304 = vsyncpa [#allocation4], 1 }
 0x2df   :  { %4306 = vsyncpa [#allocation4 + $0x1], 1 }

</bundles_post_ra>
